<compile_context>
chip_gen: v7x
topology: tpu7x:2x2x1
jax: 0.10.0
libtpu: 0.0.40
codegen_flags: <defaults>
</compile_context>

<pallas_src>
import functools

import jax
import jax.numpy as jnp
from jax.experimental import pallas as pl
from jax.experimental.pallas import tpu as pltpu

EPS = 1e-5
LANE = 128


def _round_up(n, m):
    return ((n + m - 1) // m) * m


# --------------------------------------------------------------------------- #
# Kernel: four fused Linear(+folded BN)+ReLU blocks for one batch tile.
# --------------------------------------------------------------------------- #
def game_encoder_kernel(
    x_ref,
    w1_ref, b1_ref,
    w2_ref, b2_ref,
    w3_ref, b3_ref,
    w4_ref, b4_ref,
    o_ref,
    *,
    ep_dtype,
):
    """MXU operands bf16, f32 accumulation; bias/ReLU epilogue in ep_dtype
    (bf16 on v6e/v7x, f32 on v5e). Head epilogue always f32."""

    def block(h, w_ref, b_ref):
        acc = jnp.dot(h.astype(jnp.bfloat16), w_ref[...],
                      preferred_element_type=jnp.float32)
        acc = acc.astype(ep_dtype) + b_ref[...].astype(ep_dtype)
        return jnp.maximum(acc, 0)

    h = block(x_ref[...], w1_ref, b1_ref)
    h = block(h, w2_ref, b2_ref)
    h = block(h, w3_ref, b3_ref)

    # Head: no ReLU, keep the final bias-add / store in f32.
    out = jnp.dot(h.astype(jnp.bfloat16), w4_ref[...],
                  preferred_element_type=jnp.float32) + b4_ref[...]
    o_ref[...] = out.astype(o_ref.dtype)


# --------------------------------------------------------------------------- #
# One-time parameter prep: fold BN (f32), pad K/lanes, cast weights to bf16.
# --------------------------------------------------------------------------- #
def fold_and_pack_params(params, eps=EPS):
    (w1, b1, g1, be1, m1, v1,
     w2, b2, g2, be2, m2, v2,
     w3, b3, g3, be3, m3, v3,
     w4, b4) = params

    def fold(w, b, g, be, m, v):
        scale = g * jax.lax.rsqrt(v + eps)          # (1, dout), f32
        return w * scale, (b - m) * scale + be

    w1f, b1f = fold(w1, b1, g1, be1, m1, v1)
    w2f, b2f = fold(w2, b2, g2, be2, m2, v2)
    w3f, b3f = fold(w3, b3, g3, be3, m3, v3)

    # Pad layer-1 K dim (input features) to a multiple of 128 (MXU-friendly).
    d_in = w1f.shape[0]
    k_pad = (-d_in) % LANE
    if k_pad:
        w1f = jnp.pad(w1f, ((0, k_pad), (0, 0)))

    # Pad the head output to 128 lanes (lane-dense stores).
    latent_dim = w4.shape[1]
    n_pad = (-latent_dim) % LANE
    w4p = jnp.pad(w4, ((0, 0), (0, n_pad)))
    b4p = jnp.pad(b4, ((0, 0), (0, n_pad)))

    packed = []
    for w, b in ((w1f, b1f), (w2f, b2f), (w3f, b3f), (w4p, b4p)):
        packed.append(w.astype(jnp.bfloat16))       # halve weight HBM/VMEM bytes
        packed.append(b.astype(jnp.float32))
    return tuple(packed), latent_dim


def default_bf16_epilogue():
    """bf16 VPU exists on v6e/v7x; v5e (and older) keep the f32 epilogue."""
    try:
        kind = jax.devices()[0].device_kind.lower()
    except Exception:
        return False
    return any(tag in kind for tag in ("v6", "v7", "7x"))


# --------------------------------------------------------------------------- #
# Wrapper: batch-tiled pallas_call with VMEM-resident, single-buffered weights.
# --------------------------------------------------------------------------- #
@functools.partial(
    jax.jit,
    static_argnames=("latent_dim", "use_bf16_epilogue", "block_batch"))
def game_encoder_forward(x, packed, latent_dim, use_bf16_epilogue=False,
                         block_batch=512):
    B, D = x.shape
    w1, b1, w2, b2, w3, b3, w4, b4 = packed
    d_in = w1.shape[0]                              # input_dim rounded to 128
    out_pad = w4.shape[1]                           # latent_dim rounded to 128

    # Pad features to match the prep-time K padding of w1 (zero columns).
    if D < d_in:
        x = jnp.pad(x, ((0, 0), (0, d_in - D)))

    # --- Batch tiling -------------------------------------------------------
    # Evenly split the (8-rounded) batch across grid steps so the tail tile is
    # not mostly padding; force >=2 steps for batches >=256 so both v7x
    # TensorCores get work (harmless elsewhere: weights stay VMEM-resident).
    Bp8 = max(8, _round_up(B, 8))
    steps = max(1, -(-Bp8 // block_batch))
    if steps == 1 and Bp8 >= 256:
        steps = 2
    TB = _round_up(-(-Bp8 // steps), 8)
    steps = -(-Bp8 // TB)
    Bp = steps * TB
    if Bp != B:
        x = jnp.pad(x, ((0, Bp - B), (0, 0)))
    grid = (steps,)

    const = lambda i: (0, 0)                        # weights stay VMEM-resident
    single = pl.Buffered(1)                         # constant index -> 1 buffer
    weight_specs = [
        pl.BlockSpec(w1.shape, const, pipeline_mode=single),
        pl.BlockSpec(b1.shape, const, pipeline_mode=single),
        pl.BlockSpec(w2.shape, const, pipeline_mode=single),
        pl.BlockSpec(b2.shape, const, pipeline_mode=single),
        pl.BlockSpec(w3.shape, const, pipeline_mode=single),
        pl.BlockSpec(b3.shape, const, pipeline_mode=single),
        pl.BlockSpec(w4.shape, const, pipeline_mode=single),
        pl.BlockSpec(b4.shape, const, pipeline_mode=single),
    ]

    # --- Explicit VMEM budget (default scoped limit is well below physical) --
    weight_bytes = sum(int(a.size) * a.dtype.itemsize for a in packed)
    io_bytes = 2 * TB * d_in * 4 + 2 * TB * out_pad * 4      # double-buffered x/out
    act_bytes = TB * (d_in + 1024 + 512 + 256 + out_pad) * 4  # f32 upper bound
    vmem_limit = int(1.5 * (weight_bytes + io_bytes + act_bytes)) + (4 << 20)
    vmem_limit = min(vmem_limit, 56 << 20)          # stay under v7x physical VMEM

    flops = 2 * Bp * (d_in * 1024 + 1024 * 512 + 512 * 256 + 256 * out_pad)
    bytes_accessed = weight_bytes + Bp * d_in * 4 + Bp * out_pad * 4
    cost = pl.CostEstimate(flops=flops, transcendentals=0,
                           bytes_accessed=bytes_accessed)

    ep_dtype = jnp.bfloat16 if use_bf16_epilogue else jnp.float32
    kernel = functools.partial(game_encoder_kernel, ep_dtype=ep_dtype)

    out = pl.pallas_call(
        kernel,
        out_shape=jax.ShapeDtypeStruct((Bp, out_pad), jnp.float32),
        grid_spec=pltpu.PrefetchScalarGridSpec(
            num_scalar_prefetch=0,
            grid=grid,
            in_specs=[pl.BlockSpec((TB, d_in), lambda i: (i, 0))] + weight_specs,
            out_specs=pl.BlockSpec((TB, out_pad), lambda i: (i, 0)),
        ),
        compiler_params=pltpu.CompilerParams(
            dimension_semantics=("parallel",),
            vmem_limit_bytes=vmem_limit),
        cost_estimate=cost,
    )(x, *packed)

    return out[:B, :latent_dim]


# --------------------------------------------------------------------------- #
# Synthetic params matching GameEncoder.__init__ shapes (PyTorch layout,
# Linear weights stored transposed as (in, out)).
# --------------------------------------------------------------------------- #
def init_params(key, input_dim, latent_dim=64):
    dims = [(input_dim, 1024), (1024, 512), (512, 256), (256, latent_dim)]
    params = []
    keys = jax.random.split(key, 16)
    ki = 0
    for layer_idx, (din, dout) in enumerate(dims):
        w = jax.random.normal(keys[ki], (din, dout), jnp.float32) * 0.02
        ki += 1
        b = jax.random.normal(keys[ki], (1, dout), jnp.float32) * 0.01
        ki += 1
        params += [w, b]
        if layer_idx < 3:  # first three Linears are followed by BatchNorm1d
            gamma = 1.0 + 0.1 * jax.random.normal(keys[ki], (1, dout), jnp.float32)
            ki += 1
            beta = 0.1 * jax.random.normal(keys[ki], (1, dout), jnp.float32)
            ki += 1
            params += [gamma, beta,
                       jnp.zeros((1, dout), jnp.float32),
                       jnp.ones((1, dout), jnp.float32)]
    return tuple(params)


def reference_forward_f32(x, params):
    """Pure-JAX f32 reference of the original module (eval mode)."""
    (w1, b1, g1, be1, m1, v1,
     w2, b2, g2, be2, m2, v2,
     w3, b3, g3, be3, m3, v3,
     w4, b4) = params
    h = x @ w1 + b1
    h = (h - m1) * (g1 / jnp.sqrt(v1 + EPS)) + be1
    h = jnp.maximum(h, 0.0)
    h = h @ w2 + b2
    h = (h - m2) * (g2 / jnp.sqrt(v2 + EPS)) + be2
    h = jnp.maximum(h, 0.0)
    h = h @ w3 + b3
    h = (h - m3) * (g3 / jnp.sqrt(v3 + EPS)) + be3
    h = jnp.maximum(h, 0.0)
    return h @ w4 + b4


def reference_forward_mixed(x, packed, latent_dim, use_bf16_epilogue):
    """Pure-JAX replica of the kernel's mixed-precision math."""
    w1, b1, w2, b2, w3, b3, w4, b4 = packed
    ep = jnp.bfloat16 if use_bf16_epilogue else jnp.float32
    d_in = w1.shape[0]
    if x.shape[1] < d_in:
        x = jnp.pad(x, ((0, 0), (0, d_in - x.shape[1])))

    def block(h, w, b):
        acc = jnp.dot(h.astype(jnp.bfloat16), w,
                      preferred_element_type=jnp.float32)
        acc = acc.astype(ep) + b.astype(ep)
        return jnp.maximum(acc, 0)

    h = block(x, w1, b1)
    h = block(h, w2, b2)
    h = block(h, w3, b3)
    out = jnp.dot(h.astype(jnp.bfloat16), w4,
                  preferred_element_type=jnp.float32) + b4
    return out[:, :latent_dim]


if __name__ == "__main__":
    key = jax.random.PRNGKey(0)
    k_param, k_x = jax.random.split(key)

    batch, input_dim, latent_dim = 8, 128, 64
    params = init_params(k_param, input_dim, latent_dim)
    packed, latent_dim = fold_and_pack_params(params)
    x = jax.random.normal(k_x, (batch, input_dim), jnp.float32)

    use_bf16_ep = default_bf16_epilogue()

    out = game_encoder_forward(x, packed, latent_dim,
                               use_bf16_epilogue=use_bf16_ep)
    out = jax.block_until_ready(out)
    assert out.shape == (batch, latent_dim), out.shape

    # Tight check vs. a pure-JAX replica of the same mixed-precision math.
    ref_mixed = reference_forward_mixed(x, packed, latent_dim, use_bf16_ep)
    assert jnp.allclose(out, ref_mixed, atol=2e-3, rtol=2e-3), float(
        jnp.max(jnp.abs(out - ref_mixed)))

    # Loose check vs. the original f32 eval-mode module semantics (bf16
    # weights/epilogue introduce <~1% relative error at these magnitudes).
    ref_f32 = reference_forward_f32(x, params)
    assert jnp.allclose(out, ref_f32, atol=1.5e-2, rtol=3e-2), float(
        jnp.max(jnp.abs(out - ref_f32)))

    print("KERNEL_OK")
</pallas_src>

<mosaic_0001>
module attributes {stable_mosaic.version = 11 : i64} {
  func.func @game_encoder_kernel(%arg0: i32, %arg1: memref<8x128xf32, #tpu.memory_space<vmem>>, %arg2: memref<128x1024xbf16, #tpu.memory_space<vmem>>, %arg3: memref<1x1024xf32, #tpu.memory_space<vmem>>, %arg4: memref<1024x512xbf16, #tpu.memory_space<vmem>>, %arg5: memref<1x512xf32, #tpu.memory_space<vmem>>, %arg6: memref<512x256xbf16, #tpu.memory_space<vmem>>, %arg7: memref<1x256xf32, #tpu.memory_space<vmem>>, %arg8: memref<256x128xbf16, #tpu.memory_space<vmem>>, %arg9: memref<1x128xf32, #tpu.memory_space<vmem>>, %arg10: memref<8x128xf32, #tpu.memory_space<vmem>>) attributes {dimension_semantics = [#tpu.dimension_semantics<parallel>], iteration_bounds = array<i64: 1>, scalar_prefetch = 0 : i64, scratch_operands = 0 : i64, tpu.core_type = #tpu.core_type<tc>, window_params = [{transform_indices = @transform_0, window_bounds = array<i64: 8, 128>}, {pipeline_mode = #tpu.pipeline_mode<synchronous>, transform_indices = @transform_1, window_bounds = array<i64: 128, 1024>}, {pipeline_mode = #tpu.pipeline_mode<synchronous>, transform_indices = @transform_2, window_bounds = array<i64: 1, 1024>}, {pipeline_mode = #tpu.pipeline_mode<synchronous>, transform_indices = @transform_3, window_bounds = array<i64: 1024, 512>}, {pipeline_mode = #tpu.pipeline_mode<synchronous>, transform_indices = @transform_4, window_bounds = array<i64: 1, 512>}, {pipeline_mode = #tpu.pipeline_mode<synchronous>, transform_indices = @transform_5, window_bounds = array<i64: 512, 256>}, {pipeline_mode = #tpu.pipeline_mode<synchronous>, transform_indices = @transform_6, window_bounds = array<i64: 1, 256>}, {pipeline_mode = #tpu.pipeline_mode<synchronous>, transform_indices = @transform_7, window_bounds = array<i64: 256, 128>}, {pipeline_mode = #tpu.pipeline_mode<synchronous>, transform_indices = @transform_8, window_bounds = array<i64: 1, 128>}, {transform_indices = @transform_9, window_bounds = array<i64: 8, 128>}]} {
    %c0 = arith.constant 0 : index
    %c0_0 = arith.constant 0 : index
    %0 = vector.load %arg1[%c0, %c0_0] : memref<8x128xf32, #tpu.memory_space<vmem>>, vector<8x128xf32>
    %1 = arith.truncf %0 : vector<8x128xf32> to vector<8x128xbf16>
    %c0_1 = arith.constant 0 : index
    %c0_2 = arith.constant 0 : index
    %2 = vector.load %arg2[%c0_1, %c0_2] : memref<128x1024xbf16, #tpu.memory_space<vmem>>, vector<128x1024xbf16>
    %cst = arith.constant dense<0.000000e+00> : vector<8x1024xf32>
    %3 = tpu.matmul %1, %2, %cst {dimension_numbers = #tpu.dot_dimension_numbers<[1], [0], [0], [1], [0, 0, 1, 1], [], []>} : vector<8x128xbf16>, vector<128x1024xbf16>, vector<8x1024xf32> -> vector<8x1024xf32>
    %c0_3 = arith.constant 0 : index
    %c0_4 = arith.constant 0 : index
    %4 = vector.load %arg3[%c0_3, %c0_4] : memref<1x1024xf32, #tpu.memory_space<vmem>>, vector<1x1024xf32>
    %5 = vector.broadcast %4 : vector<1x1024xf32> to vector<8x1024xf32>
    %6 = arith.addf %3, %5 : vector<8x1024xf32>
    %cst_5 = arith.constant 0.000000e+00 : f32
    %7 = vector.broadcast %cst_5 : f32 to vector<8x1024xf32>
    %8 = arith.maximumf %6, %7 : vector<8x1024xf32>
    %9 = arith.truncf %8 : vector<8x1024xf32> to vector<8x1024xbf16>
    %c0_6 = arith.constant 0 : index
    %c0_7 = arith.constant 0 : index
    %10 = vector.load %arg4[%c0_6, %c0_7] : memref<1024x512xbf16, #tpu.memory_space<vmem>>, vector<1024x512xbf16>
    %cst_8 = arith.constant dense<0.000000e+00> : vector<8x512xf32>
    %11 = tpu.matmul %9, %10, %cst_8 {dimension_numbers = #tpu.dot_dimension_numbers<[1], [0], [0], [1], [0, 0, 1, 1], [], []>} : vector<8x1024xbf16>, vector<1024x512xbf16>, vector<8x512xf32> -> vector<8x512xf32>
    %c0_9 = arith.constant 0 : index
    %c0_10 = arith.constant 0 : index
    %12 = vector.load %arg5[%c0_9, %c0_10] : memref<1x512xf32, #tpu.memory_space<vmem>>, vector<1x512xf32>
    %13 = vector.broadcast %12 : vector<1x512xf32> to vector<8x512xf32>
    %14 = arith.addf %11, %13 : vector<8x512xf32>
    %cst_11 = arith.constant 0.000000e+00 : f32
    %15 = vector.broadcast %cst_11 : f32 to vector<8x512xf32>
    %16 = arith.maximumf %14, %15 : vector<8x512xf32>
    %17 = arith.truncf %16 : vector<8x512xf32> to vector<8x512xbf16>
    %c0_12 = arith.constant 0 : index
    %c0_13 = arith.constant 0 : index
    %18 = vector.load %arg6[%c0_12, %c0_13] : memref<512x256xbf16, #tpu.memory_space<vmem>>, vector<512x256xbf16>
    %cst_14 = arith.constant dense<0.000000e+00> : vector<8x256xf32>
    %19 = tpu.matmul %17, %18, %cst_14 {dimension_numbers = #tpu.dot_dimension_numbers<[1], [0], [0], [1], [0, 0, 1, 1], [], []>} : vector<8x512xbf16>, vector<512x256xbf16>, vector<8x256xf32> -> vector<8x256xf32>
    %c0_15 = arith.constant 0 : index
    %c0_16 = arith.constant 0 : index
    %20 = vector.load %arg7[%c0_15, %c0_16] : memref<1x256xf32, #tpu.memory_space<vmem>>, vector<1x256xf32>
    %21 = vector.broadcast %20 : vector<1x256xf32> to vector<8x256xf32>
    %22 = arith.addf %19, %21 : vector<8x256xf32>
    %cst_17 = arith.constant 0.000000e+00 : f32
    %23 = vector.broadcast %cst_17 : f32 to vector<8x256xf32>
    %24 = arith.maximumf %22, %23 : vector<8x256xf32>
    %25 = arith.truncf %24 : vector<8x256xf32> to vector<8x256xbf16>
    %c0_18 = arith.constant 0 : index
    %c0_19 = arith.constant 0 : index
    %26 = vector.load %arg8[%c0_18, %c0_19] : memref<256x128xbf16, #tpu.memory_space<vmem>>, vector<256x128xbf16>
    %cst_20 = arith.constant dense<0.000000e+00> : vector<8x128xf32>
    %27 = tpu.matmul %25, %26, %cst_20 {dimension_numbers = #tpu.dot_dimension_numbers<[1], [0], [0], [1], [0, 0, 1, 1], [], []>} : vector<8x256xbf16>, vector<256x128xbf16>, vector<8x128xf32> -> vector<8x128xf32>
    %c0_21 = arith.constant 0 : index
    %c0_22 = arith.constant 0 : index
    %28 = vector.load %arg9[%c0_21, %c0_22] : memref<1x128xf32, #tpu.memory_space<vmem>>, vector<1x128xf32>
    %29 = vector.broadcast %28 : vector<1x128xf32> to vector<8x128xf32>
    %30 = arith.addf %27, %29 : vector<8x128xf32>
    %c0_23 = arith.constant 0 : index
    %c0_24 = arith.constant 0 : index
    %31 = vector.load %arg10[%c0_23, %c0_24] : memref<8x128xf32, #tpu.memory_space<vmem>>, vector<8x128xf32>
    tpu.vector_store %arg10[%c0_23, %c0_24], %30 {strides = array<i32>} : memref<8x128xf32, #tpu.memory_space<vmem>>, vector<8x128xf32>,
    return
  }
  func.func @transform_0(%arg0: i32) -> (i32, i32) {
    %c0_i32 = arith.constant 0 : i32
    %c0_i32_0 = arith.constant 0 : i32
    return %arg0, %c0_i32 : i32, i32
  }
  func.func @transform_1(%arg0: i32) -> (i32, i32) {
    %c0_i32 = arith.constant 0 : i32
    %c0_i32_0 = arith.constant 0 : i32
    %c0_i32_1 = arith.constant 0 : i32
    return %c0_i32, %c0_i32_0 : i32, i32
  }
  func.func @transform_2(%arg0: i32) -> (i32, i32) {
    %c0_i32 = arith.constant 0 : i32
    %c0_i32_0 = arith.constant 0 : i32
    %c0_i32_1 = arith.constant 0 : i32
    return %c0_i32, %c0_i32_0 : i32, i32
  }
  func.func @transform_3(%arg0: i32) -> (i32, i32) {
    %c0_i32 = arith.constant 0 : i32
    %c0_i32_0 = arith.constant 0 : i32
    %c0_i32_1 = arith.constant 0 : i32
    return %c0_i32, %c0_i32_0 : i32, i32
  }
  func.func @transform_4(%arg0: i32) -> (i32, i32) {
    %c0_i32 = arith.constant 0 : i32
    %c0_i32_0 = arith.constant 0 : i32
    %c0_i32_1 = arith.constant 0 : i32
    return %c0_i32, %c0_i32_0 : i32, i32
  }
  func.func @transform_5(%arg0: i32) -> (i32, i32) {
    %c0_i32 = arith.constant 0 : i32
    %c0_i32_0 = arith.constant 0 : i32
    %c0_i32_1 = arith.constant 0 : i32
    return %c0_i32, %c0_i32_0 : i32, i32
  }
  func.func @transform_6(%arg0: i32) -> (i32, i32) {
    %c0_i32 = arith.constant 0 : i32
    %c0_i32_0 = arith.constant 0 : i32
    %c0_i32_1 = arith.constant 0 : i32
    return %c0_i32, %c0_i32_0 : i32, i32
  }
  func.func @transform_7(%arg0: i32) -> (i32, i32) {
    %c0_i32 = arith.constant 0 : i32
    %c0_i32_0 = arith.constant 0 : i32
    %c0_i32_1 = arith.constant 0 : i32
    return %c0_i32, %c0_i32_0 : i32, i32
  }
  func.func @transform_8(%arg0: i32) -> (i32, i32) {
    %c0_i32 = arith.constant 0 : i32
    %c0_i32_0 = arith.constant 0 : i32
    %c0_i32_1 = arith.constant 0 : i32
    return %c0_i32, %c0_i32_0 : i32, i32
  }
  func.func @transform_9(%arg0: i32) -> (i32, i32) {
    %c0_i32 = arith.constant 0 : i32
    %c0_i32_0 = arith.constant 0 : i32
    return %arg0, %c0_i32 : i32, i32
  }
}

</mosaic_0001>

<bundles_post_ra>
// kernel: game_encoder_forward.1
= control target key start
LH: loop header
LB: loop body
LE: loop exit
PB: predicated region body
PF: predicated region fallthrough
CT: control target
= control target key end

     0   :  { %14 = vsyncpa [#allocation3], 0  ;;  %s4654_s0 = inlined_call_operand.hbm [shape: f32[8,128], index: 0, kind: input, shape index: {}]   ;;  %s4655_s1 = inlined_call_operand.hbm [shape: bf16[128,1024], index: 1, kind: input, shape index: {}]   ;;  %s4656_s2 = inlined_call_operand.hbm [shape: f32[1,1024], index: 2, kind: input, shape index: {}]   ;;  %s4657_s3 = inlined_call_operand.hbm [shape: bf16[1024,512], index: 3, kind: input, shape index: {}]   ;;  %s4658_s4 = inlined_call_operand.vmem [shape: f32[1,512], index: 4, kind: input, shape index: {}]   ;;  %s4659_s5 = inlined_call_operand.hbm [shape: bf16[512,256], index: 5, kind: input, shape index: {}]   ;;  %s4660_s6 = inlined_call_operand.vmem [shape: f32[1,256], index: 6, kind: input, shape index: {}]   ;;  %s4661_s7 = inlined_call_operand.hbm [shape: bf16[256,128], index: 7, kind: input, shape index: {}]   ;;  %s4662_s8 = inlined_call_operand.vmem [shape: f32[1,128], index: 8, kind: input, shape index: {}]   ;;  %s4663_s9 = inlined_call_operand.hbm [shape: f32[8,128], index: 9, kind: output, shape index: {}]  }
   0x1   :  { %15 = vsyncpa [#allocation6], 0 }
   0x2   :  { %16 = vsyncpa [#allocation9], 0 }
   0x3   :  { %17 = vsyncpa [#allocation12], 0 }
   0x4   :  { %18 = vsyncpa [#allocation4], 0  ;;  %s4423_s30 = smov [#allocation5]   ;;  %s4259_s13 = scalar_lea.hbm %s4655_s1, 8192 }
   0x5   :  { %s34_s10 = sshll.u32 %s4423_s30, 4  ;;  %p4260_p0 = scmp.ne.s32.totalorder %s4655_s1, %s4259_s13  ;;  %s35_s10 = int_to_ptr.vmem [resolvable:$true] %s34_s10 }
   0x6   :  { %p4263_p1 = scmp.lt.u32.totalorder %s4259_s13, %s4655_s1 }
   0x8   :  { %p4265_p2 = pnand %p4263_p1, %p4260_p0 }
   0xa   :  { %4268 = shalt.err (!%p4265_p2)
}
   0xb   :  { %s4269_s18 = scalar_lea.vmem %s35_s10, 8192  ;;  %p4274_p4 = scmp.lt.s32.totalorder %s35_s10, %s35_s10 }
   0xc   :  { %p4270_p3 = scmp.ne.s32.totalorder %s35_s10, %s4269_s18  ;;  %p4275_p5 = scmp.lt.s32.totalorder %s4269_s18, %s4269_s18 }
   0xe   :  { %p4276_p6 = por %p4275_p5, %p4274_p4 }
  0x10   :  { %p4277_p7 = pnand %p4276_p6, %p4270_p3 }
  0x12   :  { %4280 = shalt.err (!%p4277_p7)
}
  0x13   :  { %s4424_s19 = smov 512   ;;  %s4425_s20 = smov 32  }
  0x14   :  { %40 = dma.hbm_to_vmem [thread:$0]  %s4655_s1, 8192, %s35_s10, [#allocation6], %s4424_s19, %s4424_s19, %s4425_s20  }
  0x15   :  { %s4426_s23 = smov [#allocation8]   ;;  %s4281_s27 = scalar_lea.hbm %s4657_s3, 32768 }
  0x16   :  { %s56_s24 = sshll.u32 %s4426_s23, 4  ;;  %p4282_p8 = scmp.ne.s32.totalorder %s4657_s3, %s4281_s27  ;;  %s57_s24 = int_to_ptr.vmem [resolvable:$true] %s56_s24 }
  0x17   :  { %p4285_p9 = scmp.lt.u32.totalorder %s4281_s27, %s4657_s3 }
  0x19   :  { %p4287_p10 = pnand %p4285_p9, %p4282_p8 }
  0x1b   :  { %4290 = shalt.err (!%p4287_p10)
}
  0x1c   :  { %s4291_s12 = scalar_lea.vmem %s57_s24, 32768  ;;  %p4296_p12 = scmp.lt.s32.totalorder %s57_s24, %s57_s24 }
  0x1d   :  { %p4292_p11 = scmp.ne.s32.totalorder %s57_s24, %s4291_s12  ;;  %p4297_p13 = scmp.lt.s32.totalorder %s4291_s12, %s4291_s12 }
  0x1f   :  { %p4298_p0 = por %p4297_p13, %p4296_p12 }
  0x21   :  { %p4299_p1 = pnand %p4298_p0, %p4292_p11 }
  0x23   :  { %4302 = shalt.err (!%p4299_p1)
}
  0x24   :  { %s4427_s1 = smov 256   ;;  %s4428_s10 = smov 16  }
  0x25   :  { %62 = dma.hbm_to_vmem [thread:$0]  %s4657_s3, 32768, %s57_s24, [#allocation9], %s4427_s1, %s4427_s1, %s4428_s10  }
  0x26   :  { %s4429_s15 = smov [#allocation2]   ;;  %s4430_s17 = smov [#allocation7]  }
  0x27   :  { %s25_s16 = sshll.u32 %s4429_s15, 4  ;;  %s47_s18 = sshll.u32 %s4430_s17, 4  ;;  %s26_s16 = int_to_ptr.vmem [resolvable:$true] %s25_s16  ;;  %s48_s18 = int_to_ptr.vmem [resolvable:$true] %s47_s18 }
  0x28   :  { %s4303_s21 = scalar_lea.hbm %s4654_s0, 128 }
  0x29   :  { %p4304_p2 = scmp.ne.s32.totalorder %s4654_s0, %s4303_s21  ;;  %p4307_p3 = scmp.lt.u32.totalorder %s4303_s21, %s4654_s0 }
  0x2b   :  { %p4309_p4 = pnand %p4307_p3, %p4304_p2 }
  0x2d   :  { %4312 = shalt.err (!%p4309_p4)
}
  0x2e   :  { %s4313_s3 = scalar_lea.vmem %s26_s16, 128  ;;  %p4318_p6 = scmp.lt.s32.totalorder %s26_s16, %s26_s16 }
  0x2f   :  { %p4314_p5 = scmp.ne.s32.totalorder %s26_s16, %s4313_s3  ;;  %p4319_p7 = scmp.lt.s32.totalorder %s4313_s3, %s4313_s3 }
  0x31   :  { %p4320_p8 = por %p4319_p7, %p4318_p6 }
  0x33   :  { %p4321_p9 = pnand %p4320_p8, %p4314_p5 }
  0x35   :  { %4324 = shalt.err (!%p4321_p9)
}
  0x36   :  { %28 = dma.hbm_to_vmem [thread:$0]  %s4654_s0, 128, %s26_s16, [#allocation3]  }
  0x37   :  { %s4325_s30 = scalar_lea.hbm %s4656_s2, 128 }
  0x38   :  { %p4326_p10 = scmp.ne.s32.totalorder %s4656_s2, %s4325_s30  ;;  %p4329_p11 = scmp.lt.u32.totalorder %s4325_s30, %s4656_s2 }
  0x3a   :  { %p4331_p12 = pnand %p4329_p11, %p4326_p10 }
  0x3c   :  { %4334 = shalt.err (!%p4331_p12)
}
  0x3d   :  { %s4335_s13 = scalar_lea.vmem %s48_s18, 128  ;;  %p4340_p0 = scmp.lt.s32.totalorder %s48_s18, %s48_s18 }
  0x3e   :  { %p4336_p13 = scmp.ne.s32.totalorder %s48_s18, %s4335_s13  ;;  %p4341_p1 = scmp.lt.s32.totalorder %s4335_s13, %s4335_s13 }
  0x40   :  { %p4342_p2 = por %p4341_p1, %p4340_p0 }
  0x42   :  { %p4343_p3 = pnand %p4342_p2, %p4336_p13 }
  0x44   :  { %4346 = shalt.err (!%p4343_p3)
}
  0x45   :  { %50 = dma.hbm_to_vmem [thread:$0]  %s4656_s2, 128, %s48_s18, [#allocation6]  }
  0x46   :  { %s4431_s15 = smov [#allocation10]   ;;  %s4347_s20 = scalar_lea.hbm %s4659_s5, 8192 }
  0x47   :  { %s70_s16 = sshll.u32 %s4431_s15, 4  ;;  %p4348_p4 = scmp.ne.s32.totalorder %s4659_s5, %s4347_s20  ;;  %s71_s16 = int_to_ptr.vmem [resolvable:$true] %s70_s16 }
  0x48   :  { %p4351_p5 = scmp.lt.u32.totalorder %s4347_s20, %s4659_s5 }
  0x4a   :  { %p4353_p6 = pnand %p4351_p5, %p4348_p4 }
  0x4c   :  { %4356 = shalt.err (!%p4353_p6)
}
  0x4d   :  { %s4357_s26 = scalar_lea.vmem %s71_s16, 8192  ;;  %p4362_p8 = scmp.lt.s32.totalorder %s71_s16, %s71_s16 }
  0x4e   :  { %p4358_p7 = scmp.ne.s32.totalorder %s71_s16, %s4357_s26  ;;  %p4363_p9 = scmp.lt.s32.totalorder %s4357_s26, %s4357_s26 }
  0x50   :  { %p4364_p10 = por %p4363_p9, %p4362_p8 }
  0x52   :  { %p4365_p11 = pnand %p4364_p10, %p4358_p7 }
  0x54   :  { %4368 = shalt.err (!%p4365_p11)
}
  0x55   :  { %s4432_s2 = smov 128   ;;  %s4433_s18 = smov 8  }
  0x56   :  { %76 = dma.hbm_to_vmem [thread:$0]  %s4659_s5, 8192, %s71_s16, [#allocation9], %s4432_s2, %s4432_s2, %s4433_s18  }
  0x57   :  { %s4434_s27 = smov [#allocation11]   ;;  %s4369_s11 = scalar_lea.hbm %s4661_s7, 2048 }
  0x58   :  { %s84_s28 = sshll.u32 %s4434_s27, 4  ;;  %p4370_p12 = scmp.ne.s32.totalorder %s4661_s7, %s4369_s11  ;;  %s85_s28 = int_to_ptr.vmem [resolvable:$true] %s84_s28 }
  0x59   :  { %p4373_p13 = scmp.lt.u32.totalorder %s4369_s11, %s4661_s7 }
  0x5b   :  { %p4375_p0 = pnand %p4373_p13, %p4370_p12 }
  0x5d   :  { %4378 = shalt.err (!%p4375_p0)
}
  0x5e   :  { %s4379_s0 = scalar_lea.vmem %s85_s28, 2048  ;;  %p4384_p2 = scmp.lt.s32.totalorder %s85_s28, %s85_s28 }
  0x5f   :  { %p4380_p1 = scmp.ne.s32.totalorder %s85_s28, %s4379_s0  ;;  %p4385_p3 = scmp.lt.s32.totalorder %s4379_s0, %s4379_s0 }
  0x61   :  { %p4386_p4 = por %p4385_p3, %p4384_p2 }
  0x63   :  { %p4387_p5 = pnand %p4386_p4, %p4380_p1 }
  0x65   :  { %4390 = shalt.err (!%p4387_p5)
}
  0x66   :  { %s4435_s5 = smov 64   ;;  %s4436_s14 = smov 4  }
  0x67   :  { %90 = dma.hbm_to_vmem [thread:$0]  %s4661_s7, 2048, %s85_s28, [#allocation12], %s4435_s5, %s4435_s5, %s4436_s14  }
  0x68   :  { %4413 = dma.done.wait [#allocation3], 128  }
  0x69   :  { %4414 = vsyncadd [#allocation3], 4294967168 }
  0x6a   :  { %4415 = dma.done.wait [#allocation6], 8320  }
  0x6b   :  { %4416 = vsyncadd [#allocation6], 4294958976 }
  0x6c   :  { %4417 = dma.done.wait [#allocation9], 40960  }
  0x6d   :  { %4418 = vsyncadd [#allocation9], 4294926336 }
  0x6e   :  { %4419 = dma.done.wait [#allocation12], 2048  }
  0x6f   :  { %4420 = vsyncadd [#allocation12], 4294965248  ;;  %v4437_v0 = vmov 0   ;;  %v114_v1 = vld [vmem:[#allocation5] sm:$0xff]  ;;  %v116_v18 = vld [vmem:[#allocation5 + $0x10] sm:$0xff] }
  0x70   :  { %572 = vmatprep.mubr.bf16.mxu1 %v4437_v0  ;;  %654 = vmatprep.mubr.bf16.mxu0 %v4437_v0  ;;  %v118_v2 = vld [vmem:[#allocation5 + $0x20] sm:$0xff]  ;;  %v120_v19 = vld [vmem:[#allocation5 + $0x30] sm:$0xff]  ;;  %v115_v53 = vld [vmem:[#allocation5 + $0x8] sm:$0xff] }
  0x71   :  { %v122_v3 = vld [vmem:[#allocation5 + $0x40] sm:$0xff]  ;;  %v3291_v4 = vcombine.high %v114_v1, %v118_v2  ;;  %v3290_v5 = vcombine.low %v114_v1, %v118_v2  ;;  %v124_v20 = vld [vmem:[#allocation5 + $0x50] sm:$0xff]  ;;  %v3295_v22 = vcombine.high %v116_v18, %v120_v19  ;;  %v3294_v23 = vcombine.low %v116_v18, %v120_v19  ;;  %v119_v54 = vld [vmem:[#allocation5 + $0x28] sm:$0xff] }
  0x72   :  { %v126_v6 = vld [vmem:[#allocation5 + $0x60] sm:$0xff]  ;;  %v128_v24 = vld [vmem:[#allocation5 + $0x70] sm:$0xff]  ;;  %v112_v57 = vld [vmem:[#allocation2] sm:$0xff]  ;;  %v3293_v59 = vcombine.high %v115_v53, %v119_v54 }
  0x73   :  { %v3299_v7 = vcombine.high %v122_v3, %v126_v6  ;;  %v130_v8 = vld [vmem:[#allocation5 + $0x80] sm:$0xff]  ;;  %540 = vmatprep.subr.bf16.mxu1 %v3291_v4  ;;  %v3298_v10 = vcombine.low %v122_v3, %v126_v6  ;;  %v3303_v26 = vcombine.high %v124_v20, %v128_v24  ;;  %v132_v27 = vld [vmem:[#allocation5 + $0x90] sm:$0xff]  ;;  %622 = vmatprep.subr.bf16.mxu0 %v3295_v22  ;;  %v123_v60 = vld [vmem:[#allocation5 + $0x48] sm:$0xff] }
  0x74   :  { %v134_v9 = vld [vmem:[#allocation5 + $0xa0] sm:$0xff]  ;;  %541 = vmatpush1.bf16.msra.mxu1 %v3290_v5  ;;  %v136_v28 = vld [vmem:[#allocation5 + $0xb0] sm:$0xff]  ;;  %623 = vmatpush1.bf16.msra.mxu0 %v3294_v23  ;;  %v3302_v31 = vcombine.low %v124_v20, %v128_v24  ;;  %v127_v61 = vld [vmem:[#allocation5 + $0x68] sm:$0xff]  ;;  %v4563_v1 = vpack.c.bf16 %v112_v57, %v112_v57  ;;  %v3292_v3 = vcombine.low %v115_v53, %v119_v54 }
  0x75   :  { %542 = vmatprep.subr.bf16.mxu1 %v3299_v7  ;;  %v3307_v11 = vcombine.high %v130_v8, %v134_v9  ;;  %v138_v12 = vld [vmem:[#allocation5 + $0xc0] sm:$0xff]  ;;  %v3306_v14 = vcombine.low %v130_v8, %v134_v9  ;;  %624 = vmatprep.subr.bf16.mxu0 %v3303_v26  ;;  %v3311_v33 = vcombine.high %v132_v27, %v136_v28  ;;  %v140_v35 = vld [vmem:[#allocation5 + $0xd0] sm:$0xff]  ;;  %v131_v8 = vld [vmem:[#allocation5 + $0x88] sm:$0xff] }
  0x76   :  { %v142_v13 = vld [vmem:[#allocation5 + $0xe0] sm:$0xff]  ;;  %v144_v36 = vld [vmem:[#allocation5 + $0xf0] sm:$0xff]  ;;  %v3310_v39 = vcombine.low %v132_v27, %v136_v28  ;;  %v3301_v4 = vcombine.high %v123_v60, %v127_v61  ;;  %v135_v9 = vld [vmem:[#allocation5 + $0xa8] sm:$0xff] }
  0x77   :  { %v3315_v15 = vcombine.high %v138_v12, %v142_v13  ;;  %v146_v16 = vld [vmem:[#allocation5 + $0x100] sm:$0xff]  ;;  %v3314_v21 = vcombine.low %v138_v12, %v142_v13  ;;  %v3319_v41 = vcombine.high %v140_v35, %v144_v36  ;;  %v148_v43 = vld [vmem:[#allocation5 + $0x110] sm:$0xff]  ;;  %v3318_v47 = vcombine.low %v140_v35, %v144_v36  ;;  %v3765_v18 = vld [vmem:[#allocation8 + $0x4] ss:$16 sps:$4 sm:$0xff]  }
  0x78   :  { %543 = vmatpush1.bf16.msra.mxu1 %v3298_v10  ;;  %v150_v17 = vld [vmem:[#allocation5 + $0x120] sm:$0xff]  ;;  %625 = vmatpush1.bf16.msra.mxu0 %v3302_v31  ;;  %v152_v44 = vld [vmem:[#allocation5 + $0x130] sm:$0xff]  ;;  %v3309_v13 = vcombine.high %v131_v8, %v135_v9  ;;  %v147_v20 = vld [vmem:[#allocation5 + $0x108] sm:$0xff] }
  0x79   :  { %544 = vmatprep.subr.bf16.mxu1 %v3307_v11  ;;  %v3323_v25 = vcombine.high %v146_v16, %v150_v17  ;;  %v154_v29 = vld [vmem:[#allocation5 + $0x140] sm:$0xff]  ;;  %v3322_v32 = vcombine.low %v146_v16, %v150_v17  ;;  %626 = vmatprep.subr.bf16.mxu0 %v3311_v33  ;;  %v3327_v49 = vcombine.high %v148_v43, %v152_v44  ;;  %v156_v51 = vld [vmem:[#allocation5 + $0x150] sm:$0xff]  ;;  %v3763_v22 = vld [vmem:[#allocation8] ss:$16 sps:$4 sm:$0xff]  }
  0x7a   :  { %v158_v30 = vld [vmem:[#allocation5 + $0x160] sm:$0xff]  ;;  %v160_v52 = vld [vmem:[#allocation5 + $0x170] sm:$0xff]  ;;  %v3326_v55 = vcombine.low %v148_v43, %v152_v44  ;;  %v3300_v11 = vcombine.low %v123_v60, %v127_v61  ;;  %v3308_v17 = vcombine.low %v131_v8, %v135_v9  ;;  %v3771_v24 = vld [vmem:[#allocation8 + $0x24] ss:$16 sps:$4 sm:$0xff]  }
  0x7b   :  { %v3331_v34 = vcombine.high %v154_v29, %v158_v30  ;;  %v162_v37 = vld [vmem:[#allocation5 + $0x180] sm:$0xff]  ;;  %v3330_v40 = vcombine.low %v154_v29, %v158_v30  ;;  %v3335_v58 = vcombine.high %v156_v51, %v160_v52  ;;  %v164_v62 = vld [vmem:[#allocation5 + $0x190] sm:$0xff]  ;;  %v3334_v2 = vcombine.low %v156_v51, %v160_v52  ;;  %v155_v26 = vld [vmem:[#allocation5 + $0x148] sm:$0xff] }
  0x7c   :  { %545 = vmatpush1.bf16.msra.mxu1 %v3306_v14  ;;  %v166_v38 = vld [vmem:[#allocation5 + $0x1a0] sm:$0xff]  ;;  %627 = vmatpush1.bf16.msra.mxu0 %v3310_v39  ;;  %v168_v63 = vld [vmem:[#allocation5 + $0x1b0] sm:$0xff]  ;;  %v139_v14 = vld [vmem:[#allocation5 + $0xc8] sm:$0xff] }
  0x7d   :  { %546 = vmatprep.subr.bf16.mxu1 %v3315_v15  ;;  %v3339_v42 = vcombine.high %v162_v37, %v166_v38  ;;  %v170_v45 = vld [vmem:[#allocation5 + $0x1c0] sm:$0xff]  ;;  %v3338_v48 = vcombine.low %v162_v37, %v166_v38  ;;  %628 = vmatprep.subr.bf16.mxu0 %v3319_v41  ;;  %v3343_v5 = vcombine.high %v164_v62, %v168_v63  ;;  %v172_v6 = vld [vmem:[#allocation5 + $0x1d0] sm:$0xff]  ;;  %v143_v15 = vld [vmem:[#allocation5 + $0xe8] sm:$0xff] }
  0x7e   :  { %v174_v46 = vld [vmem:[#allocation5 + $0x1e0] sm:$0xff]  ;;  %v176_v7 = vld [vmem:[#allocation5 + $0x1f0] sm:$0xff]  ;;  %v3342_v10 = vcombine.low %v164_v62, %v168_v63  ;;  %v3317_v19 = vcombine.high %v139_v14, %v143_v15  ;;  %v3316_v23 = vcombine.low %v139_v14, %v143_v15  ;;  %v159_v27 = vld [vmem:[#allocation5 + $0x168] sm:$0xff] }
  0x7f   :  { %v3347_v50 = vcombine.high %v170_v45, %v174_v46  ;;  %v3346_v56 = vcombine.low %v170_v45, %v174_v46  ;;  %v3351_v12 = vcombine.high %v172_v6, %v176_v7  ;;  %v3350_v16 = vcombine.low %v172_v6, %v176_v7  ;;  %v3769_v28 = vld [vmem:[#allocation8 + $0x20] ss:$16 sps:$4 sm:$0xff]   ;;  %v3777_v30 = vld [vmem:[#allocation8 + $0x44] ss:$16 sps:$4 sm:$0xff]  }
  0x80   :  { %547 = vmatpush1.bf16.msra.mxu1 %v3314_v21  ;;  %629 = vmatpush1.bf16.msra.mxu0 %v3318_v47  ;;  %v151_v21 = vld [vmem:[#allocation5 + $0x128] sm:$0xff]  ;;  %v3333_v31 = vcombine.high %v155_v26, %v159_v27  ;;  %v3332_v35 = vcombine.low %v155_v26, %v159_v27  ;;  %v117_v44 = vld [vmem:[#allocation5 + $0x18] sm:$0xff] }
  0x81   :  { %548 = vmatprep.subr.bf16.mxu1 %v3323_v25  ;;  %630 = vmatprep.subr.bf16.mxu0 %v3327_v49  ;;  %v3325_v25 = vcombine.high %v147_v20, %v151_v21  ;;  %v3324_v29 = vcombine.low %v147_v20, %v151_v21  ;;  %v167_v33 = vld [vmem:[#allocation5 + $0x1a8] sm:$0xff]  ;;  %v121_v45 = vld [vmem:[#allocation5 + $0x38] sm:$0xff] }
  0x82   :  { %v3783_v36 = vld [vmem:[#allocation8 + $0x64] ss:$16 sps:$4 sm:$0xff]   ;;  %v3787_v46 = vld [vmem:[#allocation8 + $0x80] ss:$16 sps:$4 sm:$0xff]   ;;  %v3297_v51 = vcombine.high %v117_v44, %v121_v45  ;;  %v3296_v54 = vcombine.low %v117_v44, %v121_v45  ;;  %v3796_v44 = vld [vmem:[#allocation8 + $0xa8] ss:$16 sps:$4 sm:$0xff]  }
  0x83   :  { %v171_v38 = vld [vmem:[#allocation5 + $0x1c8] sm:$0xff]  ;;  %v125_v49 = vld [vmem:[#allocation5 + $0x58] sm:$0xff] }
  0x84   :  { %549 = vmatpush1.bf16.msra.mxu1 %v3322_v32  ;;  %631 = vmatpush1.bf16.msra.mxu0 %v3326_v55  ;;  %v163_v32 = vld [vmem:[#allocation5 + $0x188] sm:$0xff]  ;;  %v133_v55 = vld [vmem:[#allocation5 + $0x98] sm:$0xff] }
  0x85   :  { %550 = vmatprep.subr.bf16.mxu1 %v3331_v34  ;;  %632 = vmatprep.subr.bf16.mxu0 %v3335_v58  ;;  %v3775_v34 = vld [vmem:[#allocation8 + $0x40] ss:$16 sps:$4 sm:$0xff]   ;;  %v3341_v37 = vcombine.high %v163_v32, %v167_v33  ;;  %v3340_v41 = vcombine.low %v163_v32, %v167_v33  ;;  %v3795_v47 = vld [vmem:[#allocation8 + $0xa4] ss:$16 sps:$4 sm:$0xff]  }
  0x86   :  { %v175_v39 = vld [vmem:[#allocation5 + $0x1e8] sm:$0xff]  ;;  %v141_v61 = vld [vmem:[#allocation5 + $0xd8] sm:$0xff] }
  0x87   :  { %v3349_v43 = vcombine.high %v171_v38, %v175_v39  ;;  %v3793_v52 = vld [vmem:[#allocation8 + $0xa0] ss:$16 sps:$4 sm:$0xff]   ;;  %v3801_v53 = vld [vmem:[#allocation8 + $0xc4] ss:$16 sps:$4 sm:$0xff]  }
  0x88   :  { %551 = vmatpush1.bf16.msra.mxu1 %v3330_v40  ;;  %633 = vmatpush1.bf16.msra.mxu0 %v3334_v2  ;;  %v3781_v40 = vld [vmem:[#allocation8 + $0x60] ss:$16 sps:$4 sm:$0xff]   ;;  %v3819_v9 = vld [vmem:[#allocation8 + $0x124] ss:$16 sps:$4 sm:$0xff]  }
  0x89   :  { %552 = vmatprep.subr.bf16.mxu1 %v3339_v42  ;;  %634 = vmatprep.subr.bf16.mxu0 %v3343_v5  ;;  %v3789_v42 = vld [vmem:[#allocation8 + $0x84] ss:$16 sps:$4 sm:$0xff]   ;;  %v3799_v58 = vld [vmem:[#allocation8 + $0xc0] ss:$16 sps:$4 sm:$0xff]  }
  0x8a   :  { %v145_v62 = vld [vmem:[#allocation5 + $0xf8] sm:$0xff] }
  0x8b   :  { %v3805_v2 = vld [vmem:[#allocation8 + $0xe0] ss:$16 sps:$4 sm:$0xff]   ;;  %v3321_v7 = vcombine.high %v141_v61, %v145_v62  ;;  %v3825_v14 = vld [vmem:[#allocation8 + $0x144] ss:$16 sps:$4 sm:$0xff]  }
  0x8c   :  { %553 = vmatpush1.bf16.msra.mxu1 %v3338_v48  ;;  %635 = vmatpush1.bf16.msra.mxu0 %v3342_v10  ;;  %v3348_v48 = vcombine.low %v171_v38, %v175_v39  ;;  %v149_v5 = vld [vmem:[#allocation5 + $0x118] sm:$0xff]  ;;  %v3320_v10 = vcombine.low %v141_v61, %v145_v62  ;;  %v3778_v38 = vld [vmem:[#allocation8 + $0x48] ss:$16 sps:$4 sm:$0xff]   ;;  %v3786_v39 = vld [vmem:[#allocation8 + $0x6c] ss:$16 sps:$4 sm:$0xff]  }
  0x8d   :  { %554 = vmatprep.subr.bf16.mxu1 %v3347_v50  ;;  %636 = vmatprep.subr.bf16.mxu0 %v3351_v12  ;;  %v129_v50 = vld [vmem:[#allocation5 + $0x78] sm:$0xff]  ;;  %v3840_v61 = vld [vmem:[#allocation8 + $0x18c] ss:$16 sps:$4 sm:$0xff]   ;;  %v3838_v62 = vld [vmem:[#allocation8 + $0x188] ss:$16 sps:$4 sm:$0xff]  }
  0x8e   :  { %v3305_v57 = vcombine.high %v125_v49, %v129_v50  ;;  %v3304_v60 = vcombine.low %v125_v49, %v129_v50  ;;  %v153_v6 = vld [vmem:[#allocation5 + $0x138] sm:$0xff]  ;;  %v3810_v49 = vld [vmem:[#allocation8 + $0xec] ss:$16 sps:$4 sm:$0xff]  }
  0x8f   :  { %v3811_v8 = vld [vmem:[#allocation8 + $0x100] ss:$16 sps:$4 sm:$0xff]   ;;  %v3329_v12 = vcombine.high %v149_v5, %v153_v6  ;;  %v3328_v15 = vcombine.low %v149_v5, %v153_v6  ;;  %v3831_v20 = vld [vmem:[#allocation8 + $0x164] ss:$16 sps:$4 sm:$0xff]   ;;  %v3858_v5 = vld [vmem:[#allocation8 + $0x1ec] ss:$16 sps:$4 sm:$0xff]  }
  0x90   :  { %555 = vmatpush1.bf16.msra.mxu1 %v3346_v56  ;;  %637 = vmatpush1.bf16.msra.mxu0 %v3350_v16  ;;  %v137_v56 = vld [vmem:[#allocation5 + $0xb8] sm:$0xff]  ;;  %v3856_v6 = vld [vmem:[#allocation8 + $0x1e8] ss:$16 sps:$4 sm:$0xff]  }
  0x91   :  { %581 = vmatprep.subr.bf16.mxu1 %v3293_v59  ;;  %2278 = vmatprep.subr.bf16.mxu0 %v3765_v18  ;;  %v3807_v59 = vld [vmem:[#allocation8 + $0xe4] ss:$16 sps:$4 sm:$0xff]   ;;  %v3313_v63 = vcombine.high %v133_v55, %v137_v56  ;;  %v3841_v33 = vld [vmem:[#allocation8 + $0x1a0] ss:$16 sps:$4 sm:$0xff]  }
  0x92   :  { %v165_v16 = vld [vmem:[#allocation5 + $0x198] sm:$0xff] }
  0x93   :  { %573 = vmatmul.mubr.bf16.vlgmr.msra.gmra.mrb[0].mxu1 %v4563_v1  ;;  %655 = vmatmul.mubr.bf16.vlgmr.msra.gmra.mrb[0].mxu0 %v4563_v1  ;;  %v3837_v26 = vld [vmem:[#allocation8 + $0x184] ss:$16 sps:$4 sm:$0xff]   ;;  %v3853_v50 = vld [vmem:[#allocation8 + $0x1e0] ss:$16 sps:$4 sm:$0xff]  }
  0x94   :  { %582 = vmatpush1.bf16.msra.mxu1 %v3292_v3  ;;  %613 = vmatprep.mubr.bf16.mxu1 %v4437_v0  ;;  %v3813_v3 = vld [vmem:[#allocation8 + $0x104] ss:$16 sps:$4 sm:$0xff]  }
  0x95   :  { %583 = vmatprep.subr.bf16.mxu1 %v3301_v4  ;;  %2279 = vmatpush1.bf16.msra.mxu0 %v3763_v22  ;;  %v3312_v4 = vcombine.low %v133_v55, %v137_v56  ;;  %v173_v22 = vld [vmem:[#allocation5 + $0x1d8] sm:$0xff]  ;;  %v3822_v55 = vld [vmem:[#allocation8 + $0x12c] ss:$16 sps:$4 sm:$0xff]   ;;  %v3820_v56 = vld [vmem:[#allocation8 + $0x128] ss:$16 sps:$4 sm:$0xff]  }
  0x96   :  { %2280 = vmatprep.subr.bf16.mxu0 %v3771_v24  ;;  %v3849_v45 = vld [vmem:[#allocation8 + $0x1c4] ss:$16 sps:$4 sm:$0xff]  }
  0x98   :  { %584 = vmatpush1.bf16.msra.mxu1 %v3300_v11  ;;  %v157_v11 = vld [vmem:[#allocation5 + $0x158] sm:$0xff] }
  0x99   :  { %585 = vmatprep.subr.bf16.mxu1 %v3309_v13  ;;  %2281 = vmatpush1.bf16.msra.mxu0 %v3769_v28  ;;  %v3817_v13 = vld [vmem:[#allocation8 + $0x120] ss:$16 sps:$4 sm:$0xff]  }
  0x9a   :  { %2282 = vmatprep.subr.bf16.mxu0 %v3777_v30  ;;  %v3843_v30 = vld [vmem:[#allocation8 + $0x1a4] ss:$16 sps:$4 sm:$0xff]  }
  0x9c   :  { %586 = vmatpush1.bf16.msra.mxu1 %v3308_v17  ;;  %v169_v17 = vld [vmem:[#allocation5 + $0x1b8] sm:$0xff] }
  0x9d   :  { %587 = vmatprep.subr.bf16.mxu1 %v3317_v19  ;;  %2283 = vmatpush1.bf16.msra.mxu0 %v3775_v34  ;;  %v3823_v19 = vld [vmem:[#allocation8 + $0x140] ss:$16 sps:$4 sm:$0xff]   ;;  %v3345_v24 = vcombine.high %v165_v16, %v169_v17  ;;  %v3344_v27 = vcombine.low %v165_v16, %v169_v17  ;;  %v3766_v34 = vld [vmem:[#allocation8 + $0x8] ss:$16 sps:$4 sm:$0xff]  }
  0x9e   :  { %2284 = vmatprep.subr.bf16.mxu0 %v3783_v36  ;;  %v3772_v36 = vld [vmem:[#allocation8 + $0x28] ss:$16 sps:$4 sm:$0xff]  }
  0xa0   :  { %588 = vmatpush1.bf16.msra.mxu1 %v3316_v23  ;;  %v177_v23 = vld [vmem:[#allocation5 + $0x1f8] sm:$0xff] }
  0xa1   :  { %589 = vmatprep.subr.bf16.mxu1 %v3325_v25  ;;  %2285 = vmatpush1.bf16.msra.mxu0 %v3781_v40  ;;  %v3829_v25 = vld [vmem:[#allocation8 + $0x160] ss:$16 sps:$4 sm:$0xff]   ;;  %v3353_v28 = vcombine.high %v173_v22, %v177_v23  ;;  %v3352_v32 = vcombine.low %v173_v22, %v177_v23  ;;  %v3784_v40 = vld [vmem:[#allocation8 + $0x68] ss:$16 sps:$4 sm:$0xff]  }
  0xa2   :  { %2286 = vmatprep.subr.bf16.mxu0 %v3789_v42  ;;  %v3790_v42 = vld [vmem:[#allocation8 + $0x88] ss:$16 sps:$4 sm:$0xff]   ;;  %v3859_v23 = vld [vmem:[#allocation8 + $0x200] ss:$16 sps:$4 sm:$0xff]  }
  0xa4   :  { %590 = vmatpush1.bf16.msra.mxu1 %v3324_v29  ;;  %v3835_v29 = vld [vmem:[#allocation8 + $0x180] ss:$16 sps:$4 sm:$0xff]  }
  0xa5   :  { %591 = vmatprep.subr.bf16.mxu1 %v3333_v31  ;;  %2287 = vmatpush1.bf16.msra.mxu0 %v3787_v46  ;;  %v3768_v31 = vld [vmem:[#allocation8 + $0xc] ss:$16 sps:$4 sm:$0xff]   ;;  %v3847_v46 = vld [vmem:[#allocation8 + $0x1c0] ss:$16 sps:$4 sm:$0xff]  }
  0xa6   :  { %2288 = vmatprep.subr.bf16.mxu0 %v3795_v47  ;;  %v3802_v47 = vld [vmem:[#allocation8 + $0xc8] ss:$16 sps:$4 sm:$0xff]  }
  0xa8   :  { %592 = vmatpush1.bf16.msra.mxu1 %v3332_v35  ;;  %v3774_v35 = vld [vmem:[#allocation8 + $0x2c] ss:$16 sps:$4 sm:$0xff]  }
  0xa9   :  { %593 = vmatprep.subr.bf16.mxu1 %v3341_v37  ;;  %2289 = vmatpush1.bf16.msra.mxu0 %v3793_v52  ;;  %v3780_v37 = vld [vmem:[#allocation8 + $0x4c] ss:$16 sps:$4 sm:$0xff]   ;;  %v3861_v52 = vld [vmem:[#allocation8 + $0x204] ss:$16 sps:$4 sm:$0xff]  }
  0xaa   :  { %2290 = vmatprep.subr.bf16.mxu0 %v3801_v53  ;;  %v3816_v53 = vld [vmem:[#allocation8 + $0x10c] ss:$16 sps:$4 sm:$0xff]  }
  0xac   :  { %594 = vmatpush1.bf16.msra.mxu1 %v3340_v41  ;;  %v3792_v41 = vld [vmem:[#allocation8 + $0x8c] ss:$16 sps:$4 sm:$0xff]  }
  0xad   :  { %595 = vmatprep.subr.bf16.mxu1 %v3349_v43  ;;  %2291 = vmatpush1.bf16.msra.mxu0 %v3799_v58  ;;  %v3798_v43 = vld [vmem:[#allocation8 + $0xac] ss:$16 sps:$4 sm:$0xff]   ;;  %v3826_v58 = vld [vmem:[#allocation8 + $0x148] ss:$16 sps:$4 sm:$0xff]  }
  0xae   :  { %2292 = vmatprep.subr.bf16.mxu0 %v3807_v59  ;;  %v3834_v59 = vld [vmem:[#allocation8 + $0x16c] ss:$16 sps:$4 sm:$0xff]  }
  0xb0   :  { %596 = vmatpush1.bf16.msra.mxu1 %v3348_v48  ;;  %v3855_v48 = vld [vmem:[#allocation8 + $0x1e4] ss:$16 sps:$4 sm:$0xff]  }
  0xb1   :  { %663 = vmatprep.subr.bf16.mxu1 %v3297_v51  ;;  %2293 = vmatpush1.bf16.msra.mxu0 %v3805_v2  ;;  %v3808_v51 = vld [vmem:[#allocation8 + $0xe8] ss:$16 sps:$4 sm:$0xff]  }
  0xb2   :  { %2294 = vmatprep.subr.bf16.mxu0 %v3813_v3  ;;  %v3844_v2 = vld [vmem:[#allocation8 + $0x1a8] ss:$16 sps:$4 sm:$0xff]   ;;  %v3852_v3 = vld [vmem:[#allocation8 + $0x1cc] ss:$16 sps:$4 sm:$0xff]  }
  0xb3   :  { %614 = vmatmul.mubr.bf16.vlgmr.msra.gmra.mrb[4].mxu1 %v4563_v1 }
  0xb4   :  { %664 = vmatpush1.bf16.msra.mxu1 %v3296_v54  ;;  %695 = vmatprep.mubr.bf16.mxu1 %v4437_v0  ;;  %v161_v0 = vld [vmem:[#allocation5 + $0x178] sm:$0xff]  ;;  %v3814_v54 = vld [vmem:[#allocation8 + $0x108] ss:$16 sps:$4 sm:$0xff]  }
  0xb5   :  { %665 = vmatprep.subr.bf16.mxu1 %v3305_v57  ;;  %2295 = vmatpush1.bf16.msra.mxu0 %v3811_v8  ;;  %v3337_v18 = vcombine.high %v157_v11, %v161_v0  ;;  %v3336_v21 = vcombine.low %v157_v11, %v161_v0  ;;  %v3828_v57 = vld [vmem:[#allocation8 + $0x14c] ss:$16 sps:$4 sm:$0xff]   ;;  %v180_v8 = vlaneseq }
  0xb6   :  { %2296 = vmatprep.subr.bf16.mxu0 %v3819_v9  ;;  %v4576_v11 = vld [vmem:[#allocation7] sm:$0xff] }
  0xb7   :  { %v4571_v9 = vshrl.u32 %v180_v8, 7  ;;  %v3915_v8 = vld [vmem:[#allocation8 + $0x324] ss:$16 sps:$4 sm:$0xff]  }
  0xb8   :  { %666 = vmatpush1.bf16.msra.mxu1 %v3304_v60  ;;  %v3832_v60 = vld [vmem:[#allocation8 + $0x168] ss:$16 sps:$4 sm:$0xff]  }
  0xb9   :  { %667 = vmatprep.subr.bf16.mxu1 %v3313_v63  ;;  %2297 = vmatpush1.bf16.msra.mxu0 %v3817_v13  ;;  %v3846_v63 = vld [vmem:[#allocation8 + $0x1ac] ss:$16 sps:$4 sm:$0xff]   ;;  %v4579_v0 = vsub.s32 1, %v4571_v9 }
  0xba   :  { %2298 = vmatprep.subr.bf16.mxu0 %v3825_v14 }
  0xbb   :  { %v187_v13 = vrot.slane %v4576_v11, %v4579_v0 }
  0xbc   :  { %668 = vmatpush1.bf16.msra.mxu1 %v3312_v4  ;;  %v3850_v4 = vld [vmem:[#allocation8 + $0x1c8] ss:$16 sps:$4 sm:$0xff]  }
  0xbd   :  { %669 = vmatprep.subr.bf16.mxu1 %v3321_v7  ;;  %2299 = vmatpush1.bf16.msra.mxu0 %v3823_v19  ;;  %v3864_v7 = vld [vmem:[#allocation8 + $0x20c] ss:$16 sps:$4 sm:$0xff]  }
  0xbe   :  { %2300 = vmatprep.subr.bf16.mxu0 %v3831_v20 }
  0xc0   :  { %670 = vmatpush1.bf16.msra.mxu1 %v3320_v10  ;;  %v4574_v10 = vsub.s32 0, %v4571_v9 }
  0xc1   :  { %671 = vmatprep.subr.bf16.mxu1 %v3329_v12  ;;  %2301 = vmatpush1.bf16.msra.mxu0 %v3829_v25 }
  0xc2   :  { %2302 = vmatprep.subr.bf16.mxu0 %v3837_v26  ;;  %v183_v12 = vrot.slane %v4576_v11, %v4574_v10  ;;  %v3867_v26 = vld [vmem:[#allocation8 + $0x224] ss:$16 sps:$4 sm:$0xff]  }
  0xc4   :  { %672 = vmatpush1.bf16.msra.mxu1 %v3328_v15 }
  0xc5   :  { %673 = vmatprep.subr.bf16.mxu1 %v3337_v18  ;;  %2303 = vmatpush1.bf16.msra.mxu0 %v3835_v29  ;;  %v3868_v29 = vld [vmem:[#allocation8 + $0x228] ss:$16 sps:$4 sm:$0xff]  }
  0xc6   :  { %2304 = vmatprep.subr.bf16.mxu0 %v3843_v30  ;;  %v3873_v30 = vld [vmem:[#allocation8 + $0x244] ss:$16 sps:$4 sm:$0xff]  }
  0xc8   :  { %674 = vmatpush1.bf16.msra.mxu1 %v3336_v21 }
  0xc9   :  { %675 = vmatprep.subr.bf16.mxu1 %v3345_v24  ;;  %2305 = vmatpush1.bf16.msra.mxu0 %v3841_v33  ;;  %v3862_v24 = vld [vmem:[#allocation8 + $0x208] ss:$16 sps:$4 sm:$0xff]  }
  0xca   :  { %2306 = vmatprep.subr.bf16.mxu0 %v3849_v45  ;;  %v3886_v45 = vld [vmem:[#allocation8 + $0x288] ss:$16 sps:$4 sm:$0xff]  }
  0xcc   :  { %676 = vmatpush1.bf16.msra.mxu1 %v3344_v27  ;;  %v3870_v27 = vld [vmem:[#allocation8 + $0x22c] ss:$16 sps:$4 sm:$0xff]  }
  0xcd   :  { %677 = vmatprep.subr.bf16.mxu1 %v3353_v28  ;;  %2307 = vmatpush1.bf16.msra.mxu0 %v3847_v46  ;;  %v3865_v28 = vld [vmem:[#allocation8 + $0x220] ss:$16 sps:$4 sm:$0xff]   ;;  %v3894_v46 = vld [vmem:[#allocation8 + $0x2ac] ss:$16 sps:$4 sm:$0xff]  }
  0xce   :  { %2308 = vmatprep.subr.bf16.mxu0 %v3855_v48  ;;  %v3892_v48 = vld [vmem:[#allocation8 + $0x2a8] ss:$16 sps:$4 sm:$0xff]  }
  0xd0   :  { %678 = vmatpush1.bf16.msra.mxu1 %v3352_v32 }
  0xd1   :  { %2442 = vmatprep.subr.bf16.mxu1 %v3768_v31  ;;  %2309 = vmatpush1.bf16.msra.mxu0 %v3853_v50  ;;  %v3876_v31 = vld [vmem:[#allocation8 + $0x24c] ss:$16 sps:$4 sm:$0xff]   ;;  %v3897_v50 = vld [vmem:[#allocation8 + $0x2c4] ss:$16 sps:$4 sm:$0xff]  }
  0xd2   :  { %2319 = vmatprep.subr.bf16.mxu0 %v3861_v52  ;;  %v3895_v52 = vld [vmem:[#allocation8 + $0x2c0] ss:$16 sps:$4 sm:$0xff]  }
  0xd3   :  { %696 = vmatmul.mubr.bf16.vlgmr.msra.gmra.mrb[8].mxu1 %v4563_v1  ;;  %v3804_v1 = vld [vmem:[#allocation8 + $0xcc] ss:$16 sps:$4 sm:$0xff]  }
  0xd4   :  { %2443 = vmatpush1.bf16.msra.mxu1 %v3766_v34 }
  0xd5   :  { %2444 = vmatprep.subr.bf16.mxu1 %v3774_v35  ;;  %v3871_v35 = vld [vmem:[#allocation8 + $0x240] ss:$16 sps:$4 sm:$0xff]  }
  0xd8   :  { %2445 = vmatpush1.bf16.msra.mxu1 %v3772_v36  ;;  %v3874_v36 = vld [vmem:[#allocation8 + $0x248] ss:$16 sps:$4 sm:$0xff]  }
  0xd9   :  { %2446 = vmatprep.subr.bf16.mxu1 %v3780_v37 }
  0xdc   :  { %2447 = vmatpush1.bf16.msra.mxu1 %v3778_v38  ;;  %v3879_v38 = vld [vmem:[#allocation8 + $0x264] ss:$16 sps:$4 sm:$0xff]  }
  0xdd   :  { %2448 = vmatprep.subr.bf16.mxu1 %v3786_v39  ;;  %v3882_v39 = vld [vmem:[#allocation8 + $0x26c] ss:$16 sps:$4 sm:$0xff]  }
  0xe0   :  { %2449 = vmatpush1.bf16.msra.mxu1 %v3784_v40  ;;  %v3877_v40 = vld [vmem:[#allocation8 + $0x260] ss:$16 sps:$4 sm:$0xff]  }
  0xe1   :  { %2450 = vmatprep.subr.bf16.mxu1 %v3792_v41  ;;  %v3880_v41 = vld [vmem:[#allocation8 + $0x268] ss:$16 sps:$4 sm:$0xff]  }
  0xe4   :  { %2451 = vmatpush1.bf16.msra.mxu1 %v3790_v42  ;;  %v3885_v42 = vld [vmem:[#allocation8 + $0x284] ss:$16 sps:$4 sm:$0xff]  }
  0xe5   :  { %2452 = vmatprep.subr.bf16.mxu1 %v3798_v43  ;;  %v3888_v43 = vld [vmem:[#allocation8 + $0x28c] ss:$16 sps:$4 sm:$0xff]  }
  0xe8   :  { %2453 = vmatpush1.bf16.msra.mxu1 %v3796_v44  ;;  %v3883_v44 = vld [vmem:[#allocation8 + $0x280] ss:$16 sps:$4 sm:$0xff]  }
  0xe9   :  { %2454 = vmatprep.subr.bf16.mxu1 %v3804_v1  ;;  %v3891_v1 = vld [vmem:[#allocation8 + $0x2a4] ss:$16 sps:$4 sm:$0xff]  }
  0xec   :  { %2455 = vmatpush1.bf16.msra.mxu1 %v3802_v47  ;;  %v3889_v47 = vld [vmem:[#allocation8 + $0x2a0] ss:$16 sps:$4 sm:$0xff]  }
  0xed   :  { %2456 = vmatprep.subr.bf16.mxu1 %v3810_v49  ;;  %v194_v49 = vsub.s32 3, %v4571_v9 }
  0xf0   :  { %2457 = vmatpush1.bf16.msra.mxu1 %v3808_v51  ;;  %v3900_v51 = vld [vmem:[#allocation8 + $0x2cc] ss:$16 sps:$4 sm:$0xff]  }
  0xf1   :  { %2458 = vmatprep.subr.bf16.mxu1 %v3816_v53  ;;  %v3898_v53 = vld [vmem:[#allocation8 + $0x2c8] ss:$16 sps:$4 sm:$0xff]  }
  0xf4   :  { %2459 = vmatpush1.bf16.msra.mxu1 %v3814_v54  ;;  %v195_v54 = vrot.slane %v4576_v11, %v194_v49 }
  0xf5   :  { %2460 = vmatprep.subr.bf16.mxu1 %v3822_v55  ;;  %v3903_v55 = vld [vmem:[#allocation8 + $0x2e4] ss:$16 sps:$4 sm:$0xff]  }
  0xf8   :  { %2461 = vmatpush1.bf16.msra.mxu1 %v3820_v56  ;;  %v3906_v56 = vld [vmem:[#allocation8 + $0x2ec] ss:$16 sps:$4 sm:$0xff]  }
  0xf9   :  { %2462 = vmatprep.subr.bf16.mxu1 %v3828_v57 }
  0xfc   :  { %2463 = vmatpush1.bf16.msra.mxu1 %v3826_v58 }
  0xfd   :  { %2464 = vmatprep.subr.bf16.mxu1 %v3834_v59  ;;  %v3901_v59 = vld [vmem:[#allocation8 + $0x2e0] ss:$16 sps:$4 sm:$0xff]  }
 0x100   :  { %2465 = vmatpush1.bf16.msra.mxu1 %v3832_v60  ;;  %v3904_v60 = vld [vmem:[#allocation8 + $0x2e8] ss:$16 sps:$4 sm:$0xff]  }
 0x101   :  { %2466 = vmatprep.subr.bf16.mxu1 %v3840_v61 }
 0x104   :  { %2467 = vmatpush1.bf16.msra.mxu1 %v3838_v62 }
 0x105   :  { %2468 = vmatprep.subr.bf16.mxu1 %v3846_v63  ;;  %v3909_v63 = vld [vmem:[#allocation8 + $0x304] ss:$16 sps:$4 sm:$0xff]  }
 0x108   :  { %2469 = vmatpush1.bf16.msra.mxu1 %v3844_v2  ;;  %v3912_v2 = vld [vmem:[#allocation8 + $0x30c] ss:$16 sps:$4 sm:$0xff]  }
 0x109   :  { %2470 = vmatprep.subr.bf16.mxu1 %v3852_v3 }
 0x10c   :  { %2471 = vmatpush1.bf16.msra.mxu1 %v3850_v4 }
 0x10d   :  { %2472 = vmatprep.subr.bf16.mxu1 %v3858_v5  ;;  %v3907_v5 = vld [vmem:[#allocation8 + $0x300] ss:$16 sps:$4 sm:$0xff]  }
 0x110   :  { %2473 = vmatpush1.bf16.msra.mxu1 %v3856_v6  ;;  %v3910_v6 = vld [vmem:[#allocation8 + $0x308] ss:$16 sps:$4 sm:$0xff]  }
 0x111   :  { %2483 = vmatprep.subr.bf16.mxu1 %v3864_v7 }
 0x166   :  { %v574_v14 = vpop.f32.mrb[0].mxu1  ;;  %v4585_v32 = vpop.f32.mrb[0].mxu0 }
 0x167   :  { %v575_v15 = vadd.f32 %v574_v14, %v183_v12  ;;  %v576_v16 = vpop.f32.mrb[1].mxu1  ;;  %v4587_v33 = vpop.f32.mrb[1].mxu0  ;;  %v3918_v12 = vld [vmem:[#allocation8 + $0x32c] ss:$16 sps:$4 sm:$0xff]   ;;  %v3916_v14 = vld [vmem:[#allocation8 + $0x328] ss:$16 sps:$4 sm:$0xff]  }
 0x168   :  { %v577_v17 = vadd.f32 %v576_v16, %v187_v13  ;;  %v578_v18 = vpop.f32.mrb[2].mxu1  ;;  %v660_v34 = vpop.f32.mrb[2].mxu0  ;;  %v3913_v13 = vld [vmem:[#allocation8 + $0x320] ss:$16 sps:$4 sm:$0xff]   ;;  %v3924_v16 = vld [vmem:[#allocation8 + $0x34c] ss:$16 sps:$4 sm:$0xff]  }
 0x169   :  { %v704_v19 = vmax.f32 %v575_v15, 0.0  ;;  %v579_v20 = vpop.f32.mrb[3].mxu1  ;;  %v661_v37 = vpop.f32.mrb[3].mxu0  ;;  %v3921_v15 = vld [vmem:[#allocation8 + $0x344] ss:$16 sps:$4 sm:$0xff]  }
 0x16a   :  { %v705_v21 = vmax.f32 %v577_v17, 0.0  ;;  %v3919_v17 = vld [vmem:[#allocation8 + $0x340] ss:$16 sps:$4 sm:$0xff]   ;;  %v3922_v18 = vld [vmem:[#allocation8 + $0x348] ss:$16 sps:$4 sm:$0xff]  }
 0x16b   :  { %v712_v25 = vpack.c.bf16 %v704_v19, %v704_v19  ;;  %v3927_v19 = vld [vmem:[#allocation8 + $0x364] ss:$16 sps:$4 sm:$0xff]   ;;  %v3930_v20 = vld [vmem:[#allocation8 + $0x36c] ss:$16 sps:$4 sm:$0xff]   ;;  %v3937_v34 = vld [vmem:[#allocation8 + $0x3a0] ss:$16 sps:$4 sm:$0xff]  }
 0x16c   :  { %v713_v22 = vpack.c.bf16 %v705_v21, %v705_v21  ;;  %v3925_v21 = vld [vmem:[#allocation8 + $0x360] ss:$16 sps:$4 sm:$0xff]   ;;  %v3948_v37 = vld [vmem:[#allocation8 + $0x3cc] ss:$16 sps:$4 sm:$0xff]  }
 0x16e   :  { %2310 = vmatprep.mubr.bf16.mxu0 %v713_v22  ;;  %2474 = vmatprep.mubr.bf16.mxu1 %v713_v22  ;;  %v3928_v22 = vld [vmem:[#allocation8 + $0x368] ss:$16 sps:$4 sm:$0xff]  }
 0x16f   :  { %2311 = vmatmul.mubr.bf16.vlgmr.msra.gmra.mrb[4].mxu0 %v712_v25  ;;  %2475 = vmatmul.mubr.bf16.vlgmr.msra.gmra.mrb[12].mxu1 %v712_v25  ;;  %v190_v25 = vsub.s32 2, %v4571_v9 }
 0x170   :  { %2320 = vmatpush1.bf16.msra.mxu0 %v3859_v23  ;;  %2484 = vmatpush1.bf16.msra.mxu1 %v3862_v24  ;;  %v3933_v23 = vld [vmem:[#allocation8 + $0x384] ss:$16 sps:$4 sm:$0xff]   ;;  %v3936_v24 = vld [vmem:[#allocation8 + $0x38c] ss:$16 sps:$4 sm:$0xff]  }
 0x171   :  { %2321 = vmatprep.subr.bf16.mxu0 %v3867_v26  ;;  %2485 = vmatprep.subr.bf16.mxu1 %v3870_v27  ;;  %v3931_v26 = vld [vmem:[#allocation8 + $0x380] ss:$16 sps:$4 sm:$0xff]   ;;  %v3934_v27 = vld [vmem:[#allocation8 + $0x388] ss:$16 sps:$4 sm:$0xff]  }
 0x174   :  { %2322 = vmatpush1.bf16.msra.mxu0 %v3865_v28  ;;  %2486 = vmatpush1.bf16.msra.mxu1 %v3868_v29  ;;  %v3939_v28 = vld [vmem:[#allocation8 + $0x3a4] ss:$16 sps:$4 sm:$0xff]   ;;  %v3942_v29 = vld [vmem:[#allocation8 + $0x3ac] ss:$16 sps:$4 sm:$0xff]  }
 0x175   :  { %2323 = vmatprep.subr.bf16.mxu0 %v3873_v30  ;;  %2487 = vmatprep.subr.bf16.mxu1 %v3876_v31  ;;  %v202_v30 = vsub.s32 5, %v4571_v9  ;;  %v191_v31 = vrot.slane %v4576_v11, %v190_v25 }
 0x178   :  { %2324 = vmatpush1.bf16.msra.mxu0 %v3871_v35  ;;  %2488 = vmatpush1.bf16.msra.mxu1 %v3874_v36  ;;  %v3940_v35 = vld [vmem:[#allocation8 + $0x3a8] ss:$16 sps:$4 sm:$0xff]   ;;  %v3945_v36 = vld [vmem:[#allocation8 + $0x3c4] ss:$16 sps:$4 sm:$0xff]  }
 0x179   :  { %2325 = vmatprep.subr.bf16.mxu0 %v3879_v38  ;;  %2489 = vmatprep.subr.bf16.mxu1 %v3882_v39  ;;  %v203_v38 = vrot.slane %v4576_v11, %v202_v30  ;;  %v4003_v30 = vld [vmem:[#allocation8 + $0x500] ss:$16 sps:$4 sm:$0xff]  }
 0x17c   :  { %2326 = vmatpush1.bf16.msra.mxu0 %v3877_v40  ;;  %2490 = vmatpush1.bf16.msra.mxu1 %v3880_v41  ;;  %v3943_v40 = vld [vmem:[#allocation8 + $0x3c0] ss:$16 sps:$4 sm:$0xff]   ;;  %v3946_v41 = vld [vmem:[#allocation8 + $0x3c8] ss:$16 sps:$4 sm:$0xff]  }
 0x17d   :  { %2327 = vmatprep.subr.bf16.mxu0 %v3885_v42  ;;  %2491 = vmatprep.subr.bf16.mxu1 %v3888_v43  ;;  %v3951_v42 = vld [vmem:[#allocation8 + $0x3e4] ss:$16 sps:$4 sm:$0xff]   ;;  %v3954_v43 = vld [vmem:[#allocation8 + $0x3ec] ss:$16 sps:$4 sm:$0xff]  }
 0x180   :  { %2328 = vmatpush1.bf16.msra.mxu0 %v3883_v44  ;;  %2492 = vmatpush1.bf16.msra.mxu1 %v3886_v45  ;;  %v659_v44 = vadd.f32 %v4587_v33, %v203_v38  ;;  %v3955_v33 = vld [vmem:[#allocation8 + $0x400] ss:$16 sps:$4 sm:$0xff]   ;;  %v4017_v38 = vld [vmem:[#allocation8 + $0x544] ss:$16 sps:$4 sm:$0xff]  }
 0x181   :  { %2329 = vmatprep.subr.bf16.mxu0 %v3891_v1  ;;  %2493 = vmatprep.subr.bf16.mxu1 %v3894_v46 }
 0x184   :  { %2330 = vmatpush1.bf16.msra.mxu0 %v3889_v47  ;;  %2494 = vmatpush1.bf16.msra.mxu1 %v3892_v48  ;;  %v3949_v47 = vld [vmem:[#allocation8 + $0x3e0] ss:$16 sps:$4 sm:$0xff]   ;;  %v3952_v48 = vld [vmem:[#allocation8 + $0x3e8] ss:$16 sps:$4 sm:$0xff]  }
 0x185   :  { %2331 = vmatprep.subr.bf16.mxu0 %v3897_v50  ;;  %2495 = vmatprep.subr.bf16.mxu1 %v3900_v51  ;;  %v3957_v51 = vld [vmem:[#allocation8 + $0x404] ss:$16 sps:$4 sm:$0xff]  }
 0x186   :  { %v4593_v57 = vpop.f32.mrb[4].mxu1 }
 0x187   :  { %v617_v58 = vpop.f32.mrb[5].mxu1  ;;  %v616_v39 = vadd.f32 %v4593_v57, %v191_v31  ;;  %v3963_v57 = vld [vmem:[#allocation8 + $0x424] ss:$16 sps:$4 sm:$0xff]   ;;  %v4006_v31 = vld [vmem:[#allocation8 + $0x508] ss:$16 sps:$4 sm:$0xff]  }
 0x188   :  { %2332 = vmatpush1.bf16.msra.mxu0 %v3895_v52  ;;  %2496 = vmatpush1.bf16.msra.mxu1 %v3898_v53  ;;  %v618_v61 = vadd.f32 %v617_v58, %v195_v54  ;;  %v619_v62 = vpop.f32.mrb[6].mxu1  ;;  %v3960_v52 = vld [vmem:[#allocation8 + $0x40c] ss:$16 sps:$4 sm:$0xff]   ;;  %v709_v54 = vmax.f32 %v659_v44, 0.0  ;;  %v4021_v44 = vld [vmem:[#allocation8 + $0x560] ss:$16 sps:$4 sm:$0xff]  }
 0x189   :  { %2333 = vmatprep.subr.bf16.mxu0 %v3903_v55  ;;  %2497 = vmatprep.subr.bf16.mxu1 %v3906_v56  ;;  %v620_v3 = vpop.f32.mrb[7].mxu1  ;;  %v706_v1 = vmax.f32 %v616_v39, 0.0  ;;  %v3958_v56 = vld [vmem:[#allocation8 + $0x408] ss:$16 sps:$4 sm:$0xff]   ;;  %v3966_v58 = vld [vmem:[#allocation8 + $0x42c] ss:$16 sps:$4 sm:$0xff]  }
 0x18a   :  { %v707_v4 = vmax.f32 %v618_v61, 0.0  ;;  %v3964_v61 = vld [vmem:[#allocation8 + $0x428] ss:$16 sps:$4 sm:$0xff]   ;;  %v3969_v62 = vld [vmem:[#allocation8 + $0x444] ss:$16 sps:$4 sm:$0xff]  }
 0x18b   :  { %v714_v55 = vpack.c.bf16 %v706_v1, %v706_v1  ;;  %v3970_v3 = vld [vmem:[#allocation8 + $0x448] ss:$16 sps:$4 sm:$0xff]   ;;  %v4020_v39 = vld [vmem:[#allocation8 + $0x54c] ss:$16 sps:$4 sm:$0xff]  }
 0x18c   :  { %2334 = vmatpush1.bf16.msra.mxu0 %v3901_v59  ;;  %2498 = vmatpush1.bf16.msra.mxu1 %v3904_v60  ;;  %v715_v7 = vpack.c.bf16 %v707_v4, %v707_v4  ;;  %v717_v59 = vpack.c.bf16 %v709_v54, %v709_v54  ;;  %v3961_v60 = vld [vmem:[#allocation8 + $0x420] ss:$16 sps:$4 sm:$0xff]   ;;  %v3975_v4 = vld [vmem:[#allocation8 + $0x464] ss:$16 sps:$4 sm:$0xff]   ;;  %v4024_v1 = vld [vmem:[#allocation8 + $0x568] ss:$16 sps:$4 sm:$0xff]  }
 0x18d   :  { %2335 = vmatprep.subr.bf16.mxu0 %v3909_v63  ;;  %2499 = vmatprep.subr.bf16.mxu1 %v3912_v2  ;;  %v3972_v63 = vld [vmem:[#allocation8 + $0x44c] ss:$16 sps:$4 sm:$0xff]   ;;  %v3967_v2 = vld [vmem:[#allocation8 + $0x440] ss:$16 sps:$4 sm:$0xff]  }
 0x18e   :  { %2351 = vmatprep.mubr.bf16.mxu0 %v715_v7  ;;  %2515 = vmatprep.mubr.bf16.mxu1 %v715_v7  ;;  %v3976_v7 = vld [vmem:[#allocation8 + $0x468] ss:$16 sps:$4 sm:$0xff]   ;;  %v4038_v54 = vld [vmem:[#allocation8 + $0x5ac] ss:$16 sps:$4 sm:$0xff]  }
 0x190   :  { %2336 = vmatpush1.bf16.msra.mxu0 %v3907_v5  ;;  %2500 = vmatpush1.bf16.msra.mxu1 %v3910_v6  ;;  %v3978_v5 = vld [vmem:[#allocation8 + $0x46c] ss:$16 sps:$4 sm:$0xff]   ;;  %v3973_v6 = vld [vmem:[#allocation8 + $0x460] ss:$16 sps:$4 sm:$0xff]  }
 0x191   :  { %2337 = vmatprep.subr.bf16.mxu0 %v3915_v8  ;;  %2501 = vmatprep.subr.bf16.mxu1 %v3918_v12  ;;  %v3981_v8 = vld [vmem:[#allocation8 + $0x484] ss:$16 sps:$4 sm:$0xff]   ;;  %v3984_v12 = vld [vmem:[#allocation8 + $0x48c] ss:$16 sps:$4 sm:$0xff]  }
 0x194   :  { %2338 = vmatpush1.bf16.msra.mxu0 %v3913_v13  ;;  %2502 = vmatpush1.bf16.msra.mxu1 %v3916_v14  ;;  %v3979_v13 = vld [vmem:[#allocation8 + $0x480] ss:$16 sps:$4 sm:$0xff]   ;;  %v3982_v14 = vld [vmem:[#allocation8 + $0x488] ss:$16 sps:$4 sm:$0xff]  }
 0x195   :  { %2339 = vmatprep.subr.bf16.mxu0 %v3921_v15  ;;  %2503 = vmatprep.subr.bf16.mxu1 %v3924_v16  ;;  %v3987_v15 = vld [vmem:[#allocation8 + $0x4a4] ss:$16 sps:$4 sm:$0xff]   ;;  %v3990_v16 = vld [vmem:[#allocation8 + $0x4ac] ss:$16 sps:$4 sm:$0xff]  }
 0x198   :  { %2340 = vmatpush1.bf16.msra.mxu0 %v3919_v17  ;;  %2504 = vmatpush1.bf16.msra.mxu1 %v3922_v18  ;;  %v3985_v17 = vld [vmem:[#allocation8 + $0x4a0] ss:$16 sps:$4 sm:$0xff]   ;;  %v3988_v18 = vld [vmem:[#allocation8 + $0x4a8] ss:$16 sps:$4 sm:$0xff]  }
 0x199   :  { %2341 = vmatprep.subr.bf16.mxu0 %v3927_v19  ;;  %2505 = vmatprep.subr.bf16.mxu1 %v3930_v20  ;;  %v3993_v19 = vld [vmem:[#allocation8 + $0x4c4] ss:$16 sps:$4 sm:$0xff]   ;;  %v3996_v20 = vld [vmem:[#allocation8 + $0x4cc] ss:$16 sps:$4 sm:$0xff]  }
 0x19c   :  { %2342 = vmatpush1.bf16.msra.mxu0 %v3925_v21  ;;  %2506 = vmatpush1.bf16.msra.mxu1 %v3928_v22  ;;  %v3991_v21 = vld [vmem:[#allocation8 + $0x4c0] ss:$16 sps:$4 sm:$0xff]   ;;  %v3994_v22 = vld [vmem:[#allocation8 + $0x4c8] ss:$16 sps:$4 sm:$0xff]  }
 0x19d   :  { %2343 = vmatprep.subr.bf16.mxu0 %v3933_v23  ;;  %2507 = vmatprep.subr.bf16.mxu1 %v3936_v24  ;;  %v3999_v23 = vld [vmem:[#allocation8 + $0x4e4] ss:$16 sps:$4 sm:$0xff]   ;;  %v4002_v24 = vld [vmem:[#allocation8 + $0x4ec] ss:$16 sps:$4 sm:$0xff]  }
 0x1a0   :  { %2344 = vmatpush1.bf16.msra.mxu0 %v3931_v26  ;;  %2508 = vmatpush1.bf16.msra.mxu1 %v3934_v27  ;;  %v3997_v26 = vld [vmem:[#allocation8 + $0x4e0] ss:$16 sps:$4 sm:$0xff]   ;;  %v4000_v27 = vld [vmem:[#allocation8 + $0x4e8] ss:$16 sps:$4 sm:$0xff]  }
 0x1a1   :  { %2345 = vmatprep.subr.bf16.mxu0 %v3939_v28  ;;  %2509 = vmatprep.subr.bf16.mxu1 %v3942_v29  ;;  %v4005_v28 = vld [vmem:[#allocation8 + $0x504] ss:$16 sps:$4 sm:$0xff]   ;;  %v4008_v29 = vld [vmem:[#allocation8 + $0x50c] ss:$16 sps:$4 sm:$0xff]  }
 0x1a4   :  { %2346 = vmatpush1.bf16.msra.mxu0 %v3937_v34  ;;  %2510 = vmatpush1.bf16.msra.mxu1 %v3940_v35  ;;  %v4011_v34 = vld [vmem:[#allocation8 + $0x524] ss:$16 sps:$4 sm:$0xff]   ;;  %v4014_v35 = vld [vmem:[#allocation8 + $0x52c] ss:$16 sps:$4 sm:$0xff]  }
 0x1a5   :  { %2347 = vmatprep.subr.bf16.mxu0 %v3945_v36  ;;  %2511 = vmatprep.subr.bf16.mxu1 %v3948_v37  ;;  %v4009_v36 = vld [vmem:[#allocation8 + $0x520] ss:$16 sps:$4 sm:$0xff]   ;;  %v4012_v37 = vld [vmem:[#allocation8 + $0x528] ss:$16 sps:$4 sm:$0xff]  }
 0x1a6   :  { %v4603_v45 = vpop.f32.mrb[8].mxu1 }
 0x1a7   :  { %v4605_v46 = vpop.f32.mrb[9].mxu1 }
 0x1a8   :  { %2348 = vmatpush1.bf16.msra.mxu0 %v3943_v40  ;;  %2512 = vmatpush1.bf16.msra.mxu1 %v3946_v41  ;;  %v701_v50 = vpop.f32.mrb[10].mxu1  ;;  %v4015_v40 = vld [vmem:[#allocation8 + $0x540] ss:$16 sps:$4 sm:$0xff]   ;;  %v4018_v41 = vld [vmem:[#allocation8 + $0x548] ss:$16 sps:$4 sm:$0xff]  }
 0x1a9   :  { %2349 = vmatprep.subr.bf16.mxu0 %v3951_v42  ;;  %2513 = vmatprep.subr.bf16.mxu1 %v3954_v43  ;;  %v702_v53 = vpop.f32.mrb[11].mxu1  ;;  %v4023_v42 = vld [vmem:[#allocation8 + $0x564] ss:$16 sps:$4 sm:$0xff]   ;;  %v4026_v43 = vld [vmem:[#allocation8 + $0x56c] ss:$16 sps:$4 sm:$0xff]   ;;  %v198_v50 = vsub.s32 4, %v4571_v9 }
 0x1aa   :  { %v4035_v53 = vld [vmem:[#allocation8 + $0x5a4] ss:$16 sps:$4 sm:$0xff]  }
 0x1ac   :  { %2350 = vmatpush1.bf16.msra.mxu0 %v3949_v47  ;;  %2514 = vmatpush1.bf16.msra.mxu1 %v3952_v48  ;;  %v4029_v47 = vld [vmem:[#allocation8 + $0x584] ss:$16 sps:$4 sm:$0xff]   ;;  %v4032_v48 = vld [vmem:[#allocation8 + $0x58c] ss:$16 sps:$4 sm:$0xff]  }
 0x1ad   :  { %2360 = vmatprep.subr.bf16.mxu0 %v3957_v51  ;;  %2524 = vmatprep.subr.bf16.mxu1 %v3960_v52  ;;  %v4027_v51 = vld [vmem:[#allocation8 + $0x580] ss:$16 sps:$4 sm:$0xff]   ;;  %v4030_v52 = vld [vmem:[#allocation8 + $0x588] ss:$16 sps:$4 sm:$0xff]  }
 0x1af   :  { %2352 = vmatmul.mubr.bf16.vlgmr.msra.gmra.mrb[4].mxu0 %v714_v55  ;;  %2516 = vmatmul.mubr.bf16.vlgmr.msra.gmra.mrb[12].mxu1 %v714_v55  ;;  %v210_v55 = vsub.s32 7, %v4571_v9 }
 0x1b0   :  { %2361 = vmatpush1.bf16.msra.mxu0 %v3955_v33  ;;  %2525 = vmatpush1.bf16.msra.mxu1 %v3958_v56  ;;  %v199_v33 = vrot.slane %v4576_v11, %v198_v50  ;;  %v4033_v56 = vld [vmem:[#allocation8 + $0x5a0] ss:$16 sps:$4 sm:$0xff]   ;;  %v4104_v50 = vld [vmem:[#allocation8 + $0x70c] ss:$16 sps:$4 sm:$0xff]  }
 0x1b1   :  { %2362 = vmatprep.subr.bf16.mxu0 %v3963_v57  ;;  %2526 = vmatprep.subr.bf16.mxu1 %v3966_v58  ;;  %v4036_v57 = vld [vmem:[#allocation8 + $0x5a8] ss:$16 sps:$4 sm:$0xff]   ;;  %v4041_v58 = vld [vmem:[#allocation8 + $0x5c4] ss:$16 sps:$4 sm:$0xff]  }
 0x1b2   :  { %2392 = vmatprep.mubr.bf16.mxu0 %v717_v59  ;;  %2556 = vmatprep.mubr.bf16.mxu1 %v717_v59  ;;  %v4044_v59 = vld [vmem:[#allocation8 + $0x5cc] ss:$16 sps:$4 sm:$0xff]  }
 0x1b4   :  { %2363 = vmatpush1.bf16.msra.mxu0 %v3961_v60  ;;  %2527 = vmatpush1.bf16.msra.mxu1 %v3964_v61  ;;  %v211_v60 = vrot.slane %v4576_v11, %v210_v55  ;;  %v657_v61 = vadd.f32 %v4585_v32, %v199_v33  ;;  %v4105_v55 = vld [vmem:[#allocation8 + $0x720] ss:$16 sps:$4 sm:$0xff]   ;;  %v4108_v33 = vld [vmem:[#allocation8 + $0x728] ss:$16 sps:$4 sm:$0xff]  }
 0x1b5   :  { %2364 = vmatprep.subr.bf16.mxu0 %v3969_v62  ;;  %2528 = vmatprep.subr.bf16.mxu1 %v3972_v63  ;;  %v4039_v62 = vld [vmem:[#allocation8 + $0x5c0] ss:$16 sps:$4 sm:$0xff]   ;;  %v4042_v63 = vld [vmem:[#allocation8 + $0x5c8] ss:$16 sps:$4 sm:$0xff]  }
 0x1b8   :  { %2365 = vmatpush1.bf16.msra.mxu0 %v3967_v2  ;;  %2529 = vmatpush1.bf16.msra.mxu1 %v3970_v3  ;;  %v4047_v2 = vld [vmem:[#allocation8 + $0x5e4] ss:$16 sps:$4 sm:$0xff]   ;;  %v4050_v3 = vld [vmem:[#allocation8 + $0x5ec] ss:$16 sps:$4 sm:$0xff]  }
 0x1b9   :  { %2366 = vmatprep.subr.bf16.mxu0 %v3975_v4  ;;  %2530 = vmatprep.subr.bf16.mxu1 %v3978_v5  ;;  %v700_v4 = vadd.f32 %v4605_v46, %v211_v60  ;;  %v708_v5 = vmax.f32 %v657_v61, 0.0  ;;  %v4119_v60 = vld [vmem:[#allocation8 + $0x764] ss:$16 sps:$4 sm:$0xff]   ;;  %v4122_v61 = vld [vmem:[#allocation8 + $0x76c] ss:$16 sps:$4 sm:$0xff]  }
 0x1bb   :  { %v711_v32 = vmax.f32 %v700_v4, 0.0  ;;  %v4123_v4 = vld [vmem:[#allocation8 + $0x780] ss:$16 sps:$4 sm:$0xff]  }
 0x1bc   :  { %2367 = vmatpush1.bf16.msra.mxu0 %v3973_v6  ;;  %2531 = vmatpush1.bf16.msra.mxu1 %v3976_v7  ;;  %v4045_v6 = vld [vmem:[#allocation8 + $0x5e0] ss:$16 sps:$4 sm:$0xff]   ;;  %v4048_v7 = vld [vmem:[#allocation8 + $0x5e8] ss:$16 sps:$4 sm:$0xff]  }
 0x1bd   :  { %2368 = vmatprep.subr.bf16.mxu0 %v3981_v8  ;;  %2532 = vmatprep.subr.bf16.mxu1 %v3984_v12  ;;  %v4053_v8 = vld [vmem:[#allocation8 + $0x604] ss:$16 sps:$4 sm:$0xff]   ;;  %v4056_v12 = vld [vmem:[#allocation8 + $0x60c] ss:$16 sps:$4 sm:$0xff]   ;;  %v719_v46 = vpack.c.bf16 %v711_v32, %v711_v32  ;;  %v4132_v32 = vld [vmem:[#allocation8 + $0x7a8] ss:$16 sps:$4 sm:$0xff]  }
 0x1c0   :  { %2369 = vmatpush1.bf16.msra.mxu0 %v3979_v13  ;;  %2533 = vmatpush1.bf16.msra.mxu1 %v3982_v14  ;;  %v716_v13 = vpack.c.bf16 %v708_v5, %v708_v5  ;;  %v4051_v14 = vld [vmem:[#allocation8 + $0x600] ss:$16 sps:$4 sm:$0xff]   ;;  %v4126_v5 = vld [vmem:[#allocation8 + $0x788] ss:$16 sps:$4 sm:$0xff]  }
 0x1c1   :  { %2370 = vmatprep.subr.bf16.mxu0 %v3987_v15  ;;  %2534 = vmatprep.subr.bf16.mxu1 %v3990_v16  ;;  %v4054_v15 = vld [vmem:[#allocation8 + $0x608] ss:$16 sps:$4 sm:$0xff]   ;;  %v4059_v16 = vld [vmem:[#allocation8 + $0x624] ss:$16 sps:$4 sm:$0xff]  }
 0x1c4   :  { %2371 = vmatpush1.bf16.msra.mxu0 %v3985_v17  ;;  %2535 = vmatpush1.bf16.msra.mxu1 %v3988_v18  ;;  %v4062_v17 = vld [vmem:[#allocation8 + $0x62c] ss:$16 sps:$4 sm:$0xff]   ;;  %v4057_v18 = vld [vmem:[#allocation8 + $0x620] ss:$16 sps:$4 sm:$0xff]  }
 0x1c5   :  { %2372 = vmatprep.subr.bf16.mxu0 %v3993_v19  ;;  %2536 = vmatprep.subr.bf16.mxu1 %v3996_v20  ;;  %v4060_v19 = vld [vmem:[#allocation8 + $0x628] ss:$16 sps:$4 sm:$0xff]   ;;  %v4065_v20 = vld [vmem:[#allocation8 + $0x644] ss:$16 sps:$4 sm:$0xff]  }
 0x1c8   :  { %2373 = vmatpush1.bf16.msra.mxu0 %v3991_v21  ;;  %2537 = vmatpush1.bf16.msra.mxu1 %v3994_v22  ;;  %v4068_v21 = vld [vmem:[#allocation8 + $0x64c] ss:$16 sps:$4 sm:$0xff]   ;;  %v4063_v22 = vld [vmem:[#allocation8 + $0x640] ss:$16 sps:$4 sm:$0xff]  }
 0x1c9   :  { %2374 = vmatprep.subr.bf16.mxu0 %v3999_v23  ;;  %2538 = vmatprep.subr.bf16.mxu1 %v4002_v24  ;;  %v4066_v23 = vld [vmem:[#allocation8 + $0x648] ss:$16 sps:$4 sm:$0xff]   ;;  %v4071_v24 = vld [vmem:[#allocation8 + $0x664] ss:$16 sps:$4 sm:$0xff]  }
 0x1cc   :  { %2375 = vmatpush1.bf16.msra.mxu0 %v3997_v26  ;;  %2539 = vmatpush1.bf16.msra.mxu1 %v4000_v27  ;;  %v4074_v26 = vld [vmem:[#allocation8 + $0x66c] ss:$16 sps:$4 sm:$0xff]   ;;  %v4069_v27 = vld [vmem:[#allocation8 + $0x660] ss:$16 sps:$4 sm:$0xff]  }
 0x1cd   :  { %2376 = vmatprep.subr.bf16.mxu0 %v4005_v28  ;;  %2540 = vmatprep.subr.bf16.mxu1 %v4008_v29  ;;  %v4072_v28 = vld [vmem:[#allocation8 + $0x668] ss:$16 sps:$4 sm:$0xff]   ;;  %v4077_v29 = vld [vmem:[#allocation8 + $0x684] ss:$16 sps:$4 sm:$0xff]  }
 0x1d0   :  { %2377 = vmatpush1.bf16.msra.mxu0 %v4003_v30  ;;  %2541 = vmatpush1.bf16.msra.mxu1 %v4006_v31  ;;  %v4080_v30 = vld [vmem:[#allocation8 + $0x68c] ss:$16 sps:$4 sm:$0xff]   ;;  %v4075_v31 = vld [vmem:[#allocation8 + $0x680] ss:$16 sps:$4 sm:$0xff]  }
 0x1d1   :  { %2378 = vmatprep.subr.bf16.mxu0 %v4011_v34  ;;  %2542 = vmatprep.subr.bf16.mxu1 %v4014_v35  ;;  %v4078_v34 = vld [vmem:[#allocation8 + $0x688] ss:$16 sps:$4 sm:$0xff]   ;;  %v4083_v35 = vld [vmem:[#allocation8 + $0x6a4] ss:$16 sps:$4 sm:$0xff]  }
 0x1d4   :  { %2379 = vmatpush1.bf16.msra.mxu0 %v4009_v36  ;;  %2543 = vmatpush1.bf16.msra.mxu1 %v4012_v37  ;;  %v4086_v36 = vld [vmem:[#allocation8 + $0x6ac] ss:$16 sps:$4 sm:$0xff]   ;;  %v4081_v37 = vld [vmem:[#allocation8 + $0x6a0] ss:$16 sps:$4 sm:$0xff]  }
 0x1d5   :  { %2380 = vmatprep.subr.bf16.mxu0 %v4017_v38  ;;  %2544 = vmatprep.subr.bf16.mxu1 %v4020_v39  ;;  %v4084_v38 = vld [vmem:[#allocation8 + $0x6a8] ss:$16 sps:$4 sm:$0xff]   ;;  %v4089_v39 = vld [vmem:[#allocation8 + $0x6c4] ss:$16 sps:$4 sm:$0xff]  }
 0x1d8   :  { %2381 = vmatpush1.bf16.msra.mxu0 %v4015_v40  ;;  %2545 = vmatpush1.bf16.msra.mxu1 %v4018_v41  ;;  %v4092_v40 = vld [vmem:[#allocation8 + $0x6cc] ss:$16 sps:$4 sm:$0xff]   ;;  %v4087_v41 = vld [vmem:[#allocation8 + $0x6c0] ss:$16 sps:$4 sm:$0xff]  }
 0x1d9   :  { %2382 = vmatprep.subr.bf16.mxu0 %v4023_v42  ;;  %2546 = vmatprep.subr.bf16.mxu1 %v4026_v43  ;;  %v4090_v42 = vld [vmem:[#allocation8 + $0x6c8] ss:$16 sps:$4 sm:$0xff]   ;;  %v4095_v43 = vld [vmem:[#allocation8 + $0x6e4] ss:$16 sps:$4 sm:$0xff]  }
 0x1dc   :  { %2383 = vmatpush1.bf16.msra.mxu0 %v4021_v44  ;;  %2547 = vmatpush1.bf16.msra.mxu1 %v4024_v1  ;;  %v4098_v44 = vld [vmem:[#allocation8 + $0x6ec] ss:$16 sps:$4 sm:$0xff]   ;;  %v4093_v1 = vld [vmem:[#allocation8 + $0x6e0] ss:$16 sps:$4 sm:$0xff]  }
 0x1dd   :  { %2384 = vmatprep.subr.bf16.mxu0 %v4029_v47  ;;  %2548 = vmatprep.subr.bf16.mxu1 %v4032_v48  ;;  %v4096_v47 = vld [vmem:[#allocation8 + $0x6e8] ss:$16 sps:$4 sm:$0xff]   ;;  %v4101_v48 = vld [vmem:[#allocation8 + $0x704] ss:$16 sps:$4 sm:$0xff]  }
 0x1e0   :  { %2385 = vmatpush1.bf16.msra.mxu0 %v4027_v51  ;;  %2549 = vmatpush1.bf16.msra.mxu1 %v4030_v52  ;;  %v4099_v51 = vld [vmem:[#allocation8 + $0x700] ss:$16 sps:$4 sm:$0xff]   ;;  %v4102_v52 = vld [vmem:[#allocation8 + $0x708] ss:$16 sps:$4 sm:$0xff]  }
 0x1e1   :  { %2386 = vmatprep.subr.bf16.mxu0 %v4035_v53  ;;  %2550 = vmatprep.subr.bf16.mxu1 %v4038_v54  ;;  %v4107_v53 = vld [vmem:[#allocation8 + $0x724] ss:$16 sps:$4 sm:$0xff]   ;;  %v4110_v54 = vld [vmem:[#allocation8 + $0x72c] ss:$16 sps:$4 sm:$0xff]  }
 0x1e4   :  { %2387 = vmatpush1.bf16.msra.mxu0 %v4033_v56  ;;  %2551 = vmatpush1.bf16.msra.mxu1 %v4036_v57  ;;  %v4113_v56 = vld [vmem:[#allocation8 + $0x744] ss:$16 sps:$4 sm:$0xff]   ;;  %v4116_v57 = vld [vmem:[#allocation8 + $0x74c] ss:$16 sps:$4 sm:$0xff]  }
 0x1e5   :  { %2388 = vmatprep.subr.bf16.mxu0 %v4041_v58  ;;  %2552 = vmatprep.subr.bf16.mxu1 %v4044_v59  ;;  %v4111_v58 = vld [vmem:[#allocation8 + $0x740] ss:$16 sps:$4 sm:$0xff]   ;;  %v4114_v59 = vld [vmem:[#allocation8 + $0x748] ss:$16 sps:$4 sm:$0xff]  }
 0x1e8   :  { %2389 = vmatpush1.bf16.msra.mxu0 %v4039_v62  ;;  %2553 = vmatpush1.bf16.msra.mxu1 %v4042_v63  ;;  %v4117_v62 = vld [vmem:[#allocation8 + $0x760] ss:$16 sps:$4 sm:$0xff]   ;;  %v4120_v63 = vld [vmem:[#allocation8 + $0x768] ss:$16 sps:$4 sm:$0xff]  }
 0x1e9   :  { %2390 = vmatprep.subr.bf16.mxu0 %v4047_v2  ;;  %2554 = vmatprep.subr.bf16.mxu1 %v4050_v3  ;;  %v4125_v2 = vld [vmem:[#allocation8 + $0x784] ss:$16 sps:$4 sm:$0xff]   ;;  %v4128_v3 = vld [vmem:[#allocation8 + $0x78c] ss:$16 sps:$4 sm:$0xff]  }
 0x1ec   :  { %2391 = vmatpush1.bf16.msra.mxu0 %v4045_v6  ;;  %2555 = vmatpush1.bf16.msra.mxu1 %v4048_v7  ;;  %v206_v6 = vsub.s32 6, %v4571_v9  ;;  %v4131_v7 = vld [vmem:[#allocation8 + $0x7a4] ss:$16 sps:$4 sm:$0xff]   ;;  %v4257_v9 = vld [vmem:[#allocation11 + $0x78] sm:$0xff]  }
 0x1ed   :  { %2401 = vmatprep.subr.bf16.mxu0 %v4053_v8  ;;  %2565 = vmatprep.subr.bf16.mxu1 %v4056_v12  ;;  %v4134_v8 = vld [vmem:[#allocation8 + $0x7ac] ss:$16 sps:$4 sm:$0xff]   ;;  %v4129_v12 = vld [vmem:[#allocation8 + $0x7a0] ss:$16 sps:$4 sm:$0xff]  }
 0x1ef   :  { %2393 = vmatmul.mubr.bf16.vlgmr.msra.gmra.mrb[4].mxu0 %v716_v13  ;;  %2557 = vmatmul.mubr.bf16.vlgmr.msra.gmra.mrb[12].mxu1 %v716_v13  ;;  %v207_v13 = vrot.slane %v4576_v11, %v206_v6  ;;  %v4149_v11 = vld [vmem:[#allocation10 + $0x4] ss:$8 sps:$4 sm:$0xff]  }
 0x1f0   :  { %2402 = vmatpush1.bf16.msra.mxu0 %v4051_v14  ;;  %2566 = vmatpush1.bf16.msra.mxu1 %v4054_v15  ;;  %v4137_v14 = vld [vmem:[#allocation8 + $0x7c4] ss:$16 sps:$4 sm:$0xff]   ;;  %v4140_v15 = vld [vmem:[#allocation8 + $0x7cc] ss:$16 sps:$4 sm:$0xff]  }
 0x1f1   :  { %2403 = vmatprep.subr.bf16.mxu0 %v4059_v16  ;;  %2567 = vmatprep.subr.bf16.mxu1 %v4062_v17  ;;  %v4135_v16 = vld [vmem:[#allocation8 + $0x7c0] ss:$16 sps:$4 sm:$0xff]   ;;  %v4138_v17 = vld [vmem:[#allocation8 + $0x7c8] ss:$16 sps:$4 sm:$0xff]  }
 0x1f2   :  { %2433 = vmatprep.mubr.bf16.mxu0 %v719_v46  ;;  %2597 = vmatprep.mubr.bf16.mxu1 %v719_v46  ;;  %v698_v46 = vadd.f32 %v4603_v45, %v207_v13  ;;  %v4150_v45 = vld [vmem:[#allocation10 + $0x10] ss:$8 sps:$4 sm:$0xff]   ;;  %v4252_v6 = vld [vmem:[#allocation11 + $0x20] sm:$0xff]  }
 0x1f4   :  { %2404 = vmatpush1.bf16.msra.mxu0 %v4057_v18  ;;  %2568 = vmatpush1.bf16.msra.mxu1 %v4060_v19  ;;  %v4143_v18 = vld [vmem:[#allocation8 + $0x7e4] ss:$16 sps:$4 sm:$0xff]   ;;  %v4146_v19 = vld [vmem:[#allocation8 + $0x7ec] ss:$16 sps:$4 sm:$0xff]  }
 0x1f5   :  { %2405 = vmatprep.subr.bf16.mxu0 %v4065_v20  ;;  %2569 = vmatprep.subr.bf16.mxu1 %v4068_v21  ;;  %v4141_v20 = vld [vmem:[#allocation8 + $0x7e0] ss:$16 sps:$4 sm:$0xff]   ;;  %v4144_v21 = vld [vmem:[#allocation8 + $0x7e8] ss:$16 sps:$4 sm:$0xff]  }
 0x1f8   :  { %2406 = vmatpush1.bf16.msra.mxu0 %v4063_v22  ;;  %2570 = vmatpush1.bf16.msra.mxu1 %v4066_v23  ;;  %v710_v22 = vmax.f32 %v698_v46, 0.0  ;;  %v4147_v23 = vld [vmem:[#allocation10] ss:$8 sps:$4 sm:$0xff]  }
 0x1f9   :  { %2407 = vmatprep.subr.bf16.mxu0 %v4071_v24  ;;  %2571 = vmatprep.subr.bf16.mxu1 %v4074_v26  ;;  %v4152_v26 = vld [vmem:[#allocation10 + $0x14] ss:$8 sps:$4 sm:$0xff]  }
 0x1fa   :  { %v718_v24 = vpack.c.bf16 %v710_v22, %v710_v22 }
 0x1fc   :  { %2408 = vmatpush1.bf16.msra.mxu0 %v4069_v27  ;;  %2572 = vmatpush1.bf16.msra.mxu1 %v4072_v28  ;;  %v4155_v27 = vld [vmem:[#allocation10 + $0x24] ss:$8 sps:$4 sm:$0xff]   ;;  %v4153_v28 = vld [vmem:[#allocation10 + $0x20] ss:$8 sps:$4 sm:$0xff]  }
 0x1fd   :  { %2409 = vmatprep.subr.bf16.mxu0 %v4077_v29  ;;  %2573 = vmatprep.subr.bf16.mxu1 %v4080_v30  ;;  %v4158_v29 = vld [vmem:[#allocation10 + $0x34] ss:$8 sps:$4 sm:$0xff]   ;;  %v4156_v30 = vld [vmem:[#allocation10 + $0x30] ss:$8 sps:$4 sm:$0xff]  }
 0x200   :  { %2410 = vmatpush1.bf16.msra.mxu0 %v4075_v31  ;;  %2574 = vmatpush1.bf16.msra.mxu1 %v4078_v34  ;;  %v4161_v31 = vld [vmem:[#allocation10 + $0x44] ss:$8 sps:$4 sm:$0xff]   ;;  %v4159_v34 = vld [vmem:[#allocation10 + $0x40] ss:$8 sps:$4 sm:$0xff]  }
 0x201   :  { %2411 = vmatprep.subr.bf16.mxu0 %v4083_v35  ;;  %2575 = vmatprep.subr.bf16.mxu1 %v4086_v36  ;;  %v4164_v35 = vld [vmem:[#allocation10 + $0x54] ss:$8 sps:$4 sm:$0xff]   ;;  %v4162_v36 = vld [vmem:[#allocation10 + $0x50] ss:$8 sps:$4 sm:$0xff]  }
 0x204   :  { %2412 = vmatpush1.bf16.msra.mxu0 %v4081_v37  ;;  %2576 = vmatpush1.bf16.msra.mxu1 %v4084_v38  ;;  %v4167_v37 = vld [vmem:[#allocation10 + $0x64] ss:$8 sps:$4 sm:$0xff]   ;;  %v4165_v38 = vld [vmem:[#allocation10 + $0x60] ss:$8 sps:$4 sm:$0xff]  }
 0x205   :  { %2413 = vmatprep.subr.bf16.mxu0 %v4089_v39  ;;  %2577 = vmatprep.subr.bf16.mxu1 %v4092_v40  ;;  %v4170_v39 = vld [vmem:[#allocation10 + $0x74] ss:$8 sps:$4 sm:$0xff]   ;;  %v4168_v40 = vld [vmem:[#allocation10 + $0x70] ss:$8 sps:$4 sm:$0xff]  }
 0x208   :  { %2414 = vmatpush1.bf16.msra.mxu0 %v4087_v41  ;;  %2578 = vmatpush1.bf16.msra.mxu1 %v4090_v42  ;;  %v4173_v41 = vld [vmem:[#allocation10 + $0x84] ss:$8 sps:$4 sm:$0xff]   ;;  %v4171_v42 = vld [vmem:[#allocation10 + $0x80] ss:$8 sps:$4 sm:$0xff]  }
 0x209   :  { %2415 = vmatprep.subr.bf16.mxu0 %v4095_v43  ;;  %2579 = vmatprep.subr.bf16.mxu1 %v4098_v44  ;;  %v4176_v43 = vld [vmem:[#allocation10 + $0x94] ss:$8 sps:$4 sm:$0xff]   ;;  %v4174_v44 = vld [vmem:[#allocation10 + $0x90] ss:$8 sps:$4 sm:$0xff]  }
 0x20c   :  { %2416 = vmatpush1.bf16.msra.mxu0 %v4093_v1  ;;  %2580 = vmatpush1.bf16.msra.mxu1 %v4096_v47  ;;  %v4179_v1 = vld [vmem:[#allocation10 + $0xa4] ss:$8 sps:$4 sm:$0xff]   ;;  %v4177_v47 = vld [vmem:[#allocation10 + $0xa0] ss:$8 sps:$4 sm:$0xff]  }
 0x20d   :  { %2417 = vmatprep.subr.bf16.mxu0 %v4101_v48  ;;  %2581 = vmatprep.subr.bf16.mxu1 %v4104_v50  ;;  %v4182_v48 = vld [vmem:[#allocation10 + $0xb4] ss:$8 sps:$4 sm:$0xff]   ;;  %v4180_v50 = vld [vmem:[#allocation10 + $0xb0] ss:$8 sps:$4 sm:$0xff]  }
 0x210   :  { %2418 = vmatpush1.bf16.msra.mxu0 %v4099_v51  ;;  %2582 = vmatpush1.bf16.msra.mxu1 %v4102_v52  ;;  %v4185_v51 = vld [vmem:[#allocation10 + $0xc4] ss:$8 sps:$4 sm:$0xff]   ;;  %v4183_v52 = vld [vmem:[#allocation10 + $0xc0] ss:$8 sps:$4 sm:$0xff]  }
 0x211   :  { %2419 = vmatprep.subr.bf16.mxu0 %v4107_v53  ;;  %2583 = vmatprep.subr.bf16.mxu1 %v4110_v54  ;;  %v4188_v53 = vld [vmem:[#allocation10 + $0xd4] ss:$8 sps:$4 sm:$0xff]   ;;  %v4186_v54 = vld [vmem:[#allocation10 + $0xd0] ss:$8 sps:$4 sm:$0xff]  }
 0x214   :  { %2420 = vmatpush1.bf16.msra.mxu0 %v4105_v55  ;;  %2584 = vmatpush1.bf16.msra.mxu1 %v4108_v33  ;;  %v4191_v55 = vld [vmem:[#allocation10 + $0xe4] ss:$8 sps:$4 sm:$0xff]   ;;  %v4189_v33 = vld [vmem:[#allocation10 + $0xe0] ss:$8 sps:$4 sm:$0xff]  }
 0x215   :  { %2421 = vmatprep.subr.bf16.mxu0 %v4113_v56  ;;  %2585 = vmatprep.subr.bf16.mxu1 %v4116_v57  ;;  %v4194_v56 = vld [vmem:[#allocation10 + $0xf4] ss:$8 sps:$4 sm:$0xff]   ;;  %v4192_v57 = vld [vmem:[#allocation10 + $0xf0] ss:$8 sps:$4 sm:$0xff]  }
 0x218   :  { %2422 = vmatpush1.bf16.msra.mxu0 %v4111_v58  ;;  %2586 = vmatpush1.bf16.msra.mxu1 %v4114_v59  ;;  %v4197_v58 = vld [vmem:[#allocation10 + $0x104] ss:$8 sps:$4 sm:$0xff]  }
 0x219   :  { %2423 = vmatprep.subr.bf16.mxu0 %v4119_v60  ;;  %2587 = vmatprep.subr.bf16.mxu1 %v4122_v61  ;;  %v4243_v59 = vld [vmem:[#allocation11 + $0x40] sm:$0xff]   ;;  %v4245_v61 = vld [vmem:[#allocation11 + $0x48] sm:$0xff]  }
 0x21a   :  { %v4244_v60 = vld [vmem:[#allocation11] sm:$0xff]  }
 0x21c   :  { %2424 = vmatpush1.bf16.msra.mxu0 %v4117_v62  ;;  %2588 = vmatpush1.bf16.msra.mxu1 %v4120_v63  ;;  %v4246_v62 = vld [vmem:[#allocation11 + $0x8] sm:$0xff]   ;;  %v4247_v63 = vld [vmem:[#allocation11 + $0x50] sm:$0xff]  }
 0x21d   :  { %2425 = vmatprep.subr.bf16.mxu0 %v4125_v2  ;;  %2589 = vmatprep.subr.bf16.mxu1 %v4128_v3  ;;  %v4248_v2 = vld [vmem:[#allocation11 + $0x10] sm:$0xff]   ;;  %v4249_v3 = vld [vmem:[#allocation11 + $0x58] sm:$0xff]  }
 0x220   :  { %2426 = vmatpush1.bf16.msra.mxu0 %v4123_v4  ;;  %2590 = vmatpush1.bf16.msra.mxu1 %v4126_v5  ;;  %v4250_v4 = vld [vmem:[#allocation11 + $0x18] sm:$0xff]   ;;  %v4251_v5 = vld [vmem:[#allocation11 + $0x60] sm:$0xff]  }
 0x221   :  { %2427 = vmatprep.subr.bf16.mxu0 %v4131_v7  ;;  %2591 = vmatprep.subr.bf16.mxu1 %v4134_v8  ;;  %v4253_v7 = vld [vmem:[#allocation11 + $0x68] sm:$0xff]  }
 0x222   :  { %v4254_v8 = vld [vmem:[#allocation11 + $0x28] sm:$0xff]  }
 0x224   :  { %2428 = vmatpush1.bf16.msra.mxu0 %v4129_v12  ;;  %2592 = vmatpush1.bf16.msra.mxu1 %v4132_v32  ;;  %v4619_v12 = vld [vmem:[%s4658_s4] sm:$0xf] }
 0x225   :  { %2429 = vmatprep.subr.bf16.mxu0 %v4137_v14  ;;  %2593 = vmatprep.subr.bf16.mxu1 %v4140_v15  ;;  %v981_v32 = vrot.slane %v4619_v12, %v4574_v10  ;;  %v985_v13 = vrot.slane %v4619_v12, %v4579_v0  ;;  %v993_v14 = vrot.slane %v4619_v12, %v194_v49 }
 0x228   :  { %2430 = vmatpush1.bf16.msra.mxu0 %v4135_v16  ;;  %2594 = vmatpush1.bf16.msra.mxu1 %v4138_v17 }
 0x229   :  { %2431 = vmatprep.subr.bf16.mxu0 %v4143_v18  ;;  %2595 = vmatprep.subr.bf16.mxu1 %v4146_v19 }
 0x22c   :  { %2432 = vmatpush1.bf16.msra.mxu0 %v4141_v20  ;;  %2596 = vmatpush1.bf16.msra.mxu1 %v4144_v21 }
 0x22d   :  { %3010 = vmatprep.subr.bf16.mxu0 %v4149_v11  ;;  %3691 = vmatprep.subr.bf16.mxu1 %v4243_v59  ;;  %v989_v59 = vrot.slane %v4619_v12, %v190_v25  ;;  %v4258_v25 = vld [vmem:[#allocation11 + $0x38] sm:$0xff]  }
 0x22f   :  { %2434 = vmatmul.mubr.bf16.vlgmr.msra.gmra.mrb[4].mxu0 %v718_v24  ;;  %2598 = vmatmul.mubr.bf16.vlgmr.msra.gmra.mrb[12].mxu1 %v718_v24 }
 0x230   :  { %3011 = vmatpush1.bf16.msra.mxu0 %v4147_v23  ;;  %3692 = vmatpush3.bf16.msra.mxu1 %v4244_v60  ;;  %v4239_v60 = vld [vmem:[#allocation10 + $0x1e4] ss:$8 sps:$4 sm:$0xff]  }
 0x231   :  { %3012 = vmatprep.subr.bf16.mxu0 %v4152_v26  ;;  %3693 = vmatprep.subr.bf16.mxu1 %v4245_v61  ;;  %v4237_v61 = vld [vmem:[#allocation10 + $0x1e0] ss:$8 sps:$4 sm:$0xff]  }
 0x234   :  { %3013 = vmatpush1.bf16.msra.mxu0 %v4150_v45  ;;  %3694 = vmatpush3.bf16.msra.mxu1 %v4246_v62 }
 0x235   :  { %3014 = vmatprep.subr.bf16.mxu0 %v4155_v27  ;;  %3695 = vmatprep.subr.bf16.mxu1 %v4247_v63  ;;  %v4242_v63 = vld [vmem:[#allocation10 + $0x1f4] ss:$8 sps:$4 sm:$0xff]  }
 0x238   :  { %3015 = vmatpush1.bf16.msra.mxu0 %v4153_v28  ;;  %3696 = vmatpush3.bf16.msra.mxu1 %v4248_v2  ;;  %v4195_v28 = vld [vmem:[#allocation10 + $0x100] ss:$8 sps:$4 sm:$0xff]   ;;  %v4240_v2 = vld [vmem:[#allocation10 + $0x1f0] ss:$8 sps:$4 sm:$0xff]  }
 0x239   :  { %3016 = vmatprep.subr.bf16.mxu0 %v4158_v29  ;;  %3697 = vmatprep.subr.bf16.mxu1 %v4249_v3 }
 0x23c   :  { %3017 = vmatpush1.bf16.msra.mxu0 %v4156_v30  ;;  %3698 = vmatpush3.bf16.msra.mxu1 %v4250_v4  ;;  %v4200_v30 = vld [vmem:[#allocation10 + $0x114] ss:$8 sps:$4 sm:$0xff]  }
 0x23d   :  { %3018 = vmatprep.subr.bf16.mxu0 %v4161_v31  ;;  %3699 = vmatprep.subr.bf16.mxu1 %v4251_v5  ;;  %v4198_v31 = vld [vmem:[#allocation10 + $0x110] ss:$8 sps:$4 sm:$0xff]  }
 0x23e   :  { %v4255_v5 = vld [vmem:[#allocation11 + $0x70] sm:$0xff]  }
 0x240   :  { %3019 = vmatpush1.bf16.msra.mxu0 %v4159_v34  ;;  %3700 = vmatpush3.bf16.msra.mxu1 %v4252_v6  ;;  %v4203_v34 = vld [vmem:[#allocation10 + $0x124] ss:$8 sps:$4 sm:$0xff]   ;;  %v4256_v6 = vld [vmem:[#allocation11 + $0x30] sm:$0xff]  }
 0x241   :  { %3020 = vmatprep.subr.bf16.mxu0 %v4164_v35  ;;  %3701 = vmatprep.subr.bf16.mxu1 %v4253_v7  ;;  %v4201_v35 = vld [vmem:[#allocation10 + $0x120] ss:$8 sps:$4 sm:$0xff]   ;;  %v2678_v7 = vld [vmem:[%s4660_s6] sm:$0x3]  ;;  %s4438_s6 = smov [#allocation13]  }
 0x242   :  { %v2687_v12 = vrot.slane %v2678_v7, %v4579_v0  ;;  %s3278_s22 = sshll.u32 %s4438_s6, 4  ;;  %s3279_s22 = int_to_ptr.vmem [resolvable:$true] %s3278_s22 }
 0x243   :  { %s4391_s23 = scalar_lea.vmem %s3279_s22, 128  ;;  %p4396_p7 = scmp.lt.s32.totalorder %s3279_s22, %s3279_s22 }
 0x244   :  { %3021 = vmatpush1.bf16.msra.mxu0 %v4162_v36  ;;  %3702 = vmatpush3.bf16.msra.mxu1 %v4254_v8  ;;  %v4206_v36 = vld [vmem:[#allocation10 + $0x134] ss:$8 sps:$4 sm:$0xff]   ;;  %v2683_v8 = vrot.slane %v2678_v7, %v4574_v10  ;;  %p4392_p6 = scmp.ne.s32.totalorder %s3279_s22, %s4391_s23  ;;  %p4397_p8 = scmp.lt.s32.totalorder %s4391_s23, %s4391_s23 }
 0x245   :  { %3022 = vmatprep.subr.bf16.mxu0 %v4167_v37  ;;  %v4204_v37 = vld [vmem:[#allocation10 + $0x130] ss:$8 sps:$4 sm:$0xff]   ;;  %3703 = vmatprep.subr.bf16.mxu1 %v4255_v5 }
 0x246   :  { %p4398_p9 = por %p4397_p8, %p4396_p7 }
 0x248   :  { %3023 = vmatpush1.bf16.msra.mxu0 %v4165_v38  ;;  %v4209_v38 = vld [vmem:[#allocation10 + $0x144] ss:$8 sps:$4 sm:$0xff]   ;;  %3704 = vmatpush3.bf16.msra.mxu1 %v4256_v6  ;;  %p4399_p10 = pnand %p4398_p9, %p4392_p6 }
 0x249   :  { %3024 = vmatprep.subr.bf16.mxu0 %v4170_v39  ;;  %v4207_v39 = vld [vmem:[#allocation10 + $0x140] ss:$8 sps:$4 sm:$0xff]   ;;  %3705 = vmatprep.subr.bf16.mxu1 %v4257_v9 }
 0x24c   :  { %3025 = vmatpush1.bf16.msra.mxu0 %v4168_v40  ;;  %v4212_v40 = vld [vmem:[#allocation10 + $0x154] ss:$8 sps:$4 sm:$0xff]   ;;  %3706 = vmatpush3.bf16.msra.mxu1 %v4258_v25 }
 0x24d   :  { %3026 = vmatprep.subr.bf16.mxu0 %v4173_v41  ;;  %v4210_v41 = vld [vmem:[#allocation10 + $0x150] ss:$8 sps:$4 sm:$0xff]  }
 0x250   :  { %3027 = vmatpush1.bf16.msra.mxu0 %v4171_v42  ;;  %v4215_v42 = vld [vmem:[#allocation10 + $0x164] ss:$8 sps:$4 sm:$0xff]  }
 0x251   :  { %3028 = vmatprep.subr.bf16.mxu0 %v4176_v43  ;;  %v4213_v43 = vld [vmem:[#allocation10 + $0x160] ss:$8 sps:$4 sm:$0xff]  }
 0x254   :  { %3029 = vmatpush1.bf16.msra.mxu0 %v4174_v44  ;;  %v4218_v44 = vld [vmem:[#allocation10 + $0x174] ss:$8 sps:$4 sm:$0xff]  }
 0x255   :  { %3030 = vmatprep.subr.bf16.mxu0 %v4179_v1  ;;  %v4216_v1 = vld [vmem:[#allocation10 + $0x170] ss:$8 sps:$4 sm:$0xff]  }
 0x258   :  { %3031 = vmatpush1.bf16.msra.mxu0 %v4177_v47  ;;  %v4221_v47 = vld [vmem:[#allocation10 + $0x184] ss:$8 sps:$4 sm:$0xff]  }
 0x259   :  { %3032 = vmatprep.subr.bf16.mxu0 %v4182_v48  ;;  %v4219_v48 = vld [vmem:[#allocation10 + $0x180] ss:$8 sps:$4 sm:$0xff]  }
 0x25c   :  { %3033 = vmatpush1.bf16.msra.mxu0 %v4180_v50  ;;  %v4224_v50 = vld [vmem:[#allocation10 + $0x194] ss:$8 sps:$4 sm:$0xff]  }
 0x25d   :  { %3034 = vmatprep.subr.bf16.mxu0 %v4185_v51  ;;  %v4222_v51 = vld [vmem:[#allocation10 + $0x190] ss:$8 sps:$4 sm:$0xff]  }
 0x260   :  { %3035 = vmatpush1.bf16.msra.mxu0 %v4183_v52  ;;  %v4227_v52 = vld [vmem:[#allocation10 + $0x1a4] ss:$8 sps:$4 sm:$0xff]  }
 0x261   :  { %3036 = vmatprep.subr.bf16.mxu0 %v4188_v53  ;;  %v4225_v53 = vld [vmem:[#allocation10 + $0x1a0] ss:$8 sps:$4 sm:$0xff]  }
 0x264   :  { %3037 = vmatpush1.bf16.msra.mxu0 %v4186_v54  ;;  %v4230_v54 = vld [vmem:[#allocation10 + $0x1b4] ss:$8 sps:$4 sm:$0xff]  }
 0x265   :  { %3038 = vmatprep.subr.bf16.mxu0 %v4191_v55  ;;  %v4228_v55 = vld [vmem:[#allocation10 + $0x1b0] ss:$8 sps:$4 sm:$0xff]  }
 0x268   :  { %3039 = vmatpush1.bf16.msra.mxu0 %v4189_v33  ;;  %v4233_v33 = vld [vmem:[#allocation10 + $0x1c4] ss:$8 sps:$4 sm:$0xff]  }
 0x269   :  { %3040 = vmatprep.subr.bf16.mxu0 %v4194_v56  ;;  %v4231_v56 = vld [vmem:[#allocation10 + $0x1c0] ss:$8 sps:$4 sm:$0xff]  }
 0x26c   :  { %3041 = vmatpush1.bf16.msra.mxu0 %v4192_v57  ;;  %v4236_v57 = vld [vmem:[#allocation10 + $0x1d4] ss:$8 sps:$4 sm:$0xff]  }
 0x26d   :  { %3051 = vmatprep.subr.bf16.mxu0 %v4197_v58  ;;  %v4234_v58 = vld [vmem:[#allocation10 + $0x1d0] ss:$8 sps:$4 sm:$0xff]  }
 0x302   :  { %v2435_v15 = vpop.f32.mrb[4].mxu0  ;;  %v4628_v16 = vpop.f32.mrb[12].mxu1 }
 0x303   :  { %v3713_v17 = vadd.f32 %v2435_v15, %v981_v32  ;;  %v2437_v46 = vpop.f32.mrb[5].mxu0  ;;  %v2601_v18 = vpop.f32.mrb[13].mxu1  ;;  %v3715_v62 = vadd.f32 %v4628_v16, %v989_v59 }
 0x304   :  { %v3714_v19 = vadd.f32 %v2437_v46, %v985_v13  ;;  %v3716_v20 = vadd.f32 %v2601_v18, %v993_v14  ;;  %v2439_v21 = vpop.f32.mrb[6].mxu0  ;;  %v2603_v22 = vpop.f32.mrb[14].mxu1 }
 0x305   :  { %v2606_v11 = vmax.f32 %v3713_v17, 0.0  ;;  %v2440_v23 = vpop.f32.mrb[7].mxu0  ;;  %v2604_v24 = vpop.f32.mrb[15].mxu1  ;;  %v2608_v3 = vmax.f32 %v3715_v62, 0.0  ;;  %v3674_v22 = vld [vmem:[%s4662_s8] ss:$0 sm:$0xff] }
 0x306   :  { %v2607_v26 = vmax.f32 %v3714_v19, 0.0  ;;  %v2609_v45 = vmax.f32 %v3716_v20, 0.0 }
 0x307   :  { %v2610_v29 = vpack.c.bf16 %v2606_v11, %v2606_v11  ;;  %v2612_v4 = vpack.c.bf16 %v2608_v3, %v2608_v3 }
 0x308   :  { %v2611_v27 = vpack.c.bf16 %v2607_v26, %v2607_v26  ;;  %v2613_v49 = vpack.c.bf16 %v2609_v45, %v2609_v45 }
 0x30a   :  { %3042 = vmatprep.mubr.bf16.mxu0 %v2611_v27 }
 0x30b   :  { %3043 = vmatmul.mubr.bf16.vlgmr.msra.gmra.mrb[8].mxu0 %v2610_v29 }
 0x30c   :  { %3052 = vmatpush1.bf16.msra.mxu0 %v4195_v28  ;;  %3083 = vmatprep.mubr.bf16.mxu0 %v2613_v49 }
 0x30d   :  { %3053 = vmatprep.subr.bf16.mxu0 %v4200_v30 }
 0x310   :  { %3054 = vmatpush1.bf16.msra.mxu0 %v4198_v31 }
 0x311   :  { %3055 = vmatprep.subr.bf16.mxu0 %v4203_v34 }
 0x314   :  { %3056 = vmatpush1.bf16.msra.mxu0 %v4201_v35 }
 0x315   :  { %3057 = vmatprep.subr.bf16.mxu0 %v4206_v36 }
 0x318   :  { %3058 = vmatpush1.bf16.msra.mxu0 %v4204_v37 }
 0x319   :  { %3059 = vmatprep.subr.bf16.mxu0 %v4209_v38 }
 0x31c   :  { %3060 = vmatpush1.bf16.msra.mxu0 %v4207_v39 }
 0x31d   :  { %3061 = vmatprep.subr.bf16.mxu0 %v4212_v40 }
 0x320   :  { %3062 = vmatpush1.bf16.msra.mxu0 %v4210_v41 }
 0x321   :  { %3063 = vmatprep.subr.bf16.mxu0 %v4215_v42 }
 0x324   :  { %3064 = vmatpush1.bf16.msra.mxu0 %v4213_v43 }
 0x325   :  { %3065 = vmatprep.subr.bf16.mxu0 %v4218_v44 }
 0x328   :  { %3066 = vmatpush1.bf16.msra.mxu0 %v4216_v1 }
 0x329   :  { %3067 = vmatprep.subr.bf16.mxu0 %v4221_v47 }
 0x32c   :  { %3068 = vmatpush1.bf16.msra.mxu0 %v4219_v48 }
 0x32d   :  { %3069 = vmatprep.subr.bf16.mxu0 %v4224_v50 }
 0x330   :  { %3070 = vmatpush1.bf16.msra.mxu0 %v4222_v51 }
 0x331   :  { %3071 = vmatprep.subr.bf16.mxu0 %v4227_v52 }
 0x334   :  { %3072 = vmatpush1.bf16.msra.mxu0 %v4225_v53 }
 0x335   :  { %3073 = vmatprep.subr.bf16.mxu0 %v4230_v54 }
 0x338   :  { %3074 = vmatpush1.bf16.msra.mxu0 %v4228_v55 }
 0x339   :  { %3075 = vmatprep.subr.bf16.mxu0 %v4233_v33 }
 0x33c   :  { %3076 = vmatpush1.bf16.msra.mxu0 %v4231_v56 }
 0x33d   :  { %3077 = vmatprep.subr.bf16.mxu0 %v4236_v57 }
 0x340   :  { %3078 = vmatpush1.bf16.msra.mxu0 %v4234_v58 }
 0x341   :  { %3079 = vmatprep.subr.bf16.mxu0 %v4239_v60 }
 0x344   :  { %3080 = vmatpush1.bf16.msra.mxu0 %v4237_v61 }
 0x345   :  { %3081 = vmatprep.subr.bf16.mxu0 %v4242_v63 }
 0x348   :  { %3082 = vmatpush1.bf16.msra.mxu0 %v4240_v2 }
 0x34b   :  { %3084 = vmatmul.mubr.bf16.vlgmr.msra.gmra.mrb[8].mxu0 %v2612_v4 }
 0x41e   :  { %v3085_v32 = vpop.f32.mrb[8].mxu0 }
 0x41f   :  { %v3717_v13 = vadd.f32 %v3085_v32, %v2683_v8  ;;  %v3087_v14 = vpop.f32.mrb[9].mxu0 }
 0x420   :  { %v3718_v15 = vadd.f32 %v3087_v14, %v2687_v12  ;;  %v3089_v16 = vpop.f32.mrb[10].mxu0 }
 0x421   :  { %v3092_v17 = vmax.f32 %v3717_v13, 0.0  ;;  %v3090_v46 = vpop.f32.mrb[11].mxu0 }
 0x422   :  { %v3093_v18 = vmax.f32 %v3718_v15, 0.0 }
 0x423   :  { %v3094_v20 = vpack.c.bf16 %v3092_v17, %v3092_v17 }
 0x424   :  { %v3095_v19 = vpack.c.bf16 %v3093_v18, %v3093_v18 }
 0x426   :  { %3263 = vmatprep.mubr.bf16.mxu1 %v3095_v19 }
 0x427   :  { %3264 = vmatmul.mubr.bf16.vlgmr.msra.gmra.mrb[16].mxu1 %v3094_v20 }
 0x4fa   :  { %v3707_v21 = vpop.f32.mrb[16].mxu1 }
 0x4fb   :  { %v3708_v10 = vpop.f32.mrb[17].mxu1 }
 0x4fc   :  { %v3709_v0 = vadd.f32 %v3708_v10, %v3707_v21  ;;  %v3710_v11 = vpop.f32.mrb[18].mxu1 }
 0x4fd   :  { %v3711_v23 = vpop.f32.mrb[19].mxu1 }
 0x4fe   :  { %v3266_v24 = vadd.f32 %v3709_v0, %v3674_v22 }
 0x500   :  { %3271 = vst [vmem:[#allocation13] sm:$0xff] %v3266_v24 }
 0x501   :  { %4402 = shalt.err (!%p4399_p10)
}
 0x502   :  { %s4403_s8 = scalar_lea.hbm %s4663_s9, 128 }
 0x503   :  { %p4404_p11 = scmp.ne.s32.totalorder %s4663_s9, %s4403_s8  ;;  %p4407_p12 = scmp.lt.u32.totalorder %s4403_s8, %s4663_s9 }
 0x505   :  { %p4409_p13 = pnand %p4407_p12, %p4404_p11 }
 0x507   :  { %4412 = shalt.err (!%p4409_p13)
}
 0x508   :  { %3281 = dma.vmem_to_hbm [thread:$0]  %s3279_s22, 128, %s4663_s9, [#allocation4]  }
 0x509   :  { %4421 = dma.done.wait [#allocation4], 128  }
 0x50a   :  { %4422 = vsyncadd [#allocation4], 4294967168 }
 0x50b   :  { %3285 = vsyncpa [#allocation3], 1 }
 0x50c   :  { %3286 = vsyncpa [#allocation6], 1 }
 0x50d   :  { %3287 = vsyncpa [#allocation9], 1 }
 0x50e   :  { %3288 = vsyncpa [#allocation12], 1 }
 0x50f   :  { %3289 = vsyncpa [#allocation4], 1 }

</bundles_post_ra>
